<compile_context>
chip_gen: v7x
topology: tpu7x:2x2x1
jax: 0.10.0
libtpu: 0.0.40
codegen_flags: <defaults>
</compile_context>

<pallas_src>
import jax
import jax.numpy as jnp
from jax import lax
from jax.experimental import pallas as pl
from jax.experimental.pallas import tpu as pltpu

# Tile caps (a dim that fits under its cap becomes a single full tile).
M_CAP = 256   # rows (B*Ho*Wo); multiple of 16 for bf16 sublane packing
N_CAP = 512   # output channels
K_CAP = 512   # reduction (kh*kw*cin)


def _round_up(x, m):
    return (x + m - 1) // m * m


def _pick_tile(size, align, cap):
    """Return (padded_size, tile). Single full tile if it fits under `cap`."""
    p = _round_up(size, align)
    if p <= cap:
        return p, p
    return _round_up(size, cap), cap


# ----------------------------------------------------------------------------
# Fused Pallas kernel: (a @ b) * scale + shift [+ residual] [ReLU]
#   res_mode: 'none'   -> no residual
#             'add'    -> residual tensor added in f32
#             'matmul' -> residual is a second (1x1-conv) matmul + affine, fully fused
# ----------------------------------------------------------------------------
def _make_fused_kernel(relu, res_mode, multi_k):
    if multi_k:
        def kernel(a_ref, b_ref, s_ref, t_ref, *rest):
            if res_mode == 'add':
                r_ref, o_ref, acc_ref = rest
            else:
                o_ref, acc_ref = rest

            @pl.when(pl.program_id(2) == 0)
            def _():
                acc_ref[...] = jnp.zeros_like(acc_ref)

            acc_ref[...] += jnp.dot(a_ref[...], b_ref[...],
                                    preferred_element_type=jnp.float32)

            @pl.when(pl.program_id(2) == pl.num_programs(2) - 1)
            def _():
                y = acc_ref[...] * s_ref[...] + t_ref[...]
                if res_mode == 'add':
                    y = y + r_ref[...].astype(jnp.float32)
                if relu:
                    y = jnp.maximum(y, 0.0)
                o_ref[...] = y.astype(o_ref.dtype)
        return kernel

    if res_mode == 'matmul':
        def kernel(a_ref, b_ref, s_ref, t_ref, ra_ref, rb_ref, rs_ref, rt_ref, o_ref):
            # Single K step: no scratch accumulator, write the output block directly.
            y = jnp.dot(a_ref[...], b_ref[...], preferred_element_type=jnp.float32)
            y = y * s_ref[...] + t_ref[...]
            r = jnp.dot(ra_ref[...], rb_ref[...], preferred_element_type=jnp.float32)
            y = y + (r * rs_ref[...] + rt_ref[...])       # fused downsample residual
            if relu:
                y = jnp.maximum(y, 0.0)
            o_ref[...] = y.astype(o_ref.dtype)
        return kernel

    def kernel(a_ref, b_ref, s_ref, t_ref, *rest):
        if res_mode == 'add':
            r_ref, o_ref = rest
        else:
            (o_ref,) = rest
        y = jnp.dot(a_ref[...], b_ref[...], preferred_element_type=jnp.float32)
        y = y * s_ref[...] + t_ref[...]
        if res_mode == 'add':
            y = y + r_ref[...].astype(jnp.float32)
        if relu:
            y = jnp.maximum(y, 0.0)
        o_ref[...] = y.astype(o_ref.dtype)
    return kernel


def matmul_affine(a, cp, residual=None, res_mm=None, relu=True, out_dtype=jnp.float32):
    """out = maybe_relu((a @ W) * scale + shift [+ residual]).

    `cp` holds the pre-padded bf16 weight (Kp, Np), pre-padded f32 scale/shift (1, Np)
    and static tiling metadata (produced once by `prep_conv`).
    `res_mm = (a_d, cp_d)` fuses a 1x1-conv+BN downsample residual into the same call.
    """
    M, K = a.shape
    N, Kp, Np, tk, tn = cp['N'], cp['Kp'], cp['Np'], cp['tk'], cp['tn']
    assert K == cp['K']
    Mp, tm = _pick_tile(M, 16, M_CAP)
    nk = Kp // tk

    # Fused downsample only in the single-K fast path; otherwise compute it as a
    # separate call and fall back to the residual-add path (still fused add/ReLU).
    if res_mm is not None:
        ad, cpd = res_mm
        if nk > 1 or cpd['Kp'] // cpd['tk'] > 1 or cpd['Np'] != Np:
            residual = matmul_affine(ad, cpd, relu=False, out_dtype=jnp.float32)
            res_mm = None

    a_p = jnp.pad(a.astype(jnp.bfloat16), ((0, Mp - M), (0, Kp - K)))
    grid_m, grid_n = Mp // tm, Np // tn
    inputs = [a_p, cp['w'], cp['s'], cp['t']]

    if nk == 1:
        in_specs = [
            pl.BlockSpec((tm, Kp), lambda i, j: (i, 0)),
            pl.BlockSpec((Kp, tn), lambda i, j: (0, j)),
            pl.BlockSpec((1, tn), lambda i, j: (0, j)),
            pl.BlockSpec((1, tn), lambda i, j: (0, j)),
        ]
        if res_mm is not None:
            ad, cpd = res_mm
            Kd, Kdp = cpd['K'], cpd['Kp']
            ad_p = jnp.pad(ad.astype(jnp.bfloat16), ((0, Mp - M), (0, Kdp - Kd)))
            inputs += [ad_p, cpd['w'], cpd['s'], cpd['t']]
            in_specs += [
                pl.BlockSpec((tm, Kdp), lambda i, j: (i, 0)),
                pl.BlockSpec((Kdp, tn), lambda i, j: (0, j)),
                pl.BlockSpec((1, tn), lambda i, j: (0, j)),
                pl.BlockSpec((1, tn), lambda i, j: (0, j)),
            ]
            res_mode = 'matmul'
        elif residual is not None:
            r_p = jnp.pad(residual.astype(jnp.float32), ((0, Mp - M), (0, Np - N)))
            inputs.append(r_p)
            in_specs.append(pl.BlockSpec((tm, tn), lambda i, j: (i, j)))
            res_mode = 'add'
        else:
            res_mode = 'none'
        out_spec = pl.BlockSpec((tm, tn), lambda i, j: (i, j))
        grid = (grid_m, grid_n)
        dims = ("parallel", "parallel")
        scratch = []
    else:
        in_specs = [
            pl.BlockSpec((tm, tk), lambda i, j, k: (i, k)),
            pl.BlockSpec((tk, tn), lambda i, j, k: (k, j)),
            pl.BlockSpec((1, tn), lambda i, j, k: (0, j)),
            pl.BlockSpec((1, tn), lambda i, j, k: (0, j)),
        ]
        if residual is not None:
            r_p = jnp.pad(residual.astype(jnp.float32), ((0, Mp - M), (0, Np - N)))
            inputs.append(r_p)
            in_specs.append(pl.BlockSpec((tm, tn), lambda i, j, k: (i, j)))
            res_mode = 'add'
        else:
            res_mode = 'none'
        out_spec = pl.BlockSpec((tm, tn), lambda i, j, k: (i, j))
        grid = (grid_m, grid_n, nk)
        dims = ("parallel", "parallel", "arbitrary")
        scratch = [pltpu.VMEM((tm, tn), jnp.float32)]

    out = pl.pallas_call(
        _make_fused_kernel(relu, res_mode, nk > 1),
        out_shape=jax.ShapeDtypeStruct((Mp, Np), out_dtype),
        grid_spec=pltpu.PrefetchScalarGridSpec(
            num_scalar_prefetch=0,
            grid=grid,
            in_specs=in_specs,
            out_specs=out_spec,
            scratch_shapes=scratch,
        ),
        compiler_params=pltpu.CompilerParams(dimension_semantics=dims),
    )(*inputs)
    return out[:M, :N]


# ----------------------------------------------------------------------------
# Conv via im2col (glue) feeding the fused Pallas kernel
# ----------------------------------------------------------------------------
def _im2col(x, kh, kw, stride, pad):
    B, H, W, C = x.shape
    if pad > 0:
        x = jnp.pad(x, ((0, 0), (pad, pad), (pad, pad), (0, 0)))
    Hp, Wp = x.shape[1], x.shape[2]
    Ho = (Hp - kh) // stride + 1
    Wo = (Wp - kw) // stride + 1
    cols = []
    for i in range(kh):
        for j in range(kw):
            cols.append(x[:, i:i + stride * Ho:stride, j:j + stride * Wo:stride, :])
    patches = jnp.concatenate(cols, axis=-1)              # (B, Ho, Wo, kh*kw*C)
    return patches.reshape(B * Ho * Wo, kh * kw * C), (B, Ho, Wo)


def conv_bn(x, cp, stride=1, relu=True, residual=None, res_mm=None,
            out_dtype=jnp.float32):
    """Conv2d(bias=False) + folded BN + optional residual (+ fused downsample) + ReLU."""
    kh, kw = cp['kh'], cp['kw']
    pad = (kh - 1) // 2
    # Cast before im2col so the materialized patches intermediate is bf16 (half HBM).
    patches, (B, Ho, Wo) = _im2col(x.astype(jnp.bfloat16), kh, kw, stride, pad)
    res2d = residual.reshape(B * Ho * Wo, cp['N']) if residual is not None else None
    y = matmul_affine(patches, cp, residual=res2d, res_mm=res_mm,
                      relu=relu, out_dtype=out_dtype)
    return y.reshape(B, Ho, Wo, cp['N'])


# ----------------------------------------------------------------------------
# BasicBlock forward
# ----------------------------------------------------------------------------
def basic_block_nhwc(x, p):
    stride = p['stride']
    # conv1 -> bn1 -> relu (output kept in bf16: it only feeds the bf16 matmul of conv2)
    h = conv_bn(x, p['conv1'], stride=stride, relu=True, out_dtype=jnp.bfloat16)
    if p['down'] is not None:
        # 1x1-conv + BN downsample fused into the SAME Pallas call as conv2:
        # a second MXU matmul + affine inside the epilogue (no separate residual tensor).
        ds_in, _ = _im2col(x.astype(jnp.bfloat16), 1, 1, stride, 0)
        return conv_bn(h, p['conv2'], stride=1, relu=True,
                       res_mm=(ds_in, p['down']), out_dtype=jnp.float32)
    # conv2 -> bn2 -> (+identity residual) -> relu, all fused in one Pallas call
    return conv_bn(h, p['conv2'], stride=1, relu=True, residual=x,
                   out_dtype=jnp.float32)


def two_block_forward(x_nchw, p1, p2):
    x = jnp.transpose(x_nchw, (0, 2, 3, 1)).astype(jnp.float32)   # NCHW -> NHWC
    x = basic_block_nhwc(x, p1)
    x = basic_block_nhwc(x, p2)
    return jnp.transpose(x, (0, 3, 1, 2))                         # NHWC -> NCHW


# ----------------------------------------------------------------------------
# Parameters: deterministic synthetic weights matching BasicBlock shapes
# ----------------------------------------------------------------------------
class KeyGen:
    def __init__(self, seed):
        self.key = jax.random.PRNGKey(seed)
        self.i = 0

    def __call__(self):
        self.i += 1
        return jax.random.fold_in(self.key, self.i)


def conv_w(kg, cin, cout, k):
    return jax.random.normal(kg(), (cout, cin, k, k), jnp.float32) * (1.0 / (cin * k * k) ** 0.5)


def bn_stats(kg, c):
    gamma = 1.0 + 0.1 * jax.random.normal(kg(), (c,), jnp.float32)
    beta = 0.1 * jax.random.normal(kg(), (c,), jnp.float32)
    rmean = 0.1 * jax.random.normal(kg(), (c,), jnp.float32)
    rvar = 1.0 + 0.1 * jax.random.uniform(kg(), (c,), jnp.float32)
    return gamma, beta, rmean, rvar


def fold_bn(gamma, beta, mean, var, eps=1e-5):
    # TODO(synk): BatchNorm evaluated in inference mode (running stats folded to affine).
    scale = gamma / jnp.sqrt(var + eps)
    shift = beta - mean * scale
    return scale, shift


def make_basicblock_raw(kg, inplanes, planes, stride, downsample):
    p = {'stride': stride}
    p['conv1_w'] = conv_w(kg, inplanes, planes, 3)
    p['bn1'] = bn_stats(kg, planes)
    p['conv2_w'] = conv_w(kg, planes, planes, 3)
    p['bn2'] = bn_stats(kg, planes)
    if downsample:
        p['down_w'] = conv_w(kg, inplanes, planes, 1)   # 1x1 conv in the downsample path
        p['bn_d'] = bn_stats(kg, planes)
    else:
        p['down_w'] = None
    return p


def prep_conv(w_oihw, scale, shift):
    """One-time weight layout: OIHW -> (kh*kw*cin, cout), padded, bf16; padded BN affine."""
    cout, cin, kh, kw = w_oihw.shape
    K, N = kh * kw * cin, cout
    Kp, tk = _pick_tile(K, 128, K_CAP)
    Np, tn = _pick_tile(N, 128, N_CAP)
    wm = jnp.transpose(w_oihw, (2, 3, 1, 0)).reshape(K, N)
    w_p = jnp.pad(wm, ((0, Kp - K), (0, Np - N))).astype(jnp.bfloat16)
    s_p = jnp.pad(scale.reshape(1, N), ((0, 0), (0, Np - N))).astype(jnp.float32)
    t_p = jnp.pad(shift.reshape(1, N), ((0, 0), (0, Np - N))).astype(jnp.float32)
    return dict(w=w_p, s=s_p, t=t_p, K=K, N=N, Kp=Kp, Np=Np, tk=tk, tn=tn, kh=kh, kw=kw)


def prepare_basicblock(raw):
    s1, t1 = fold_bn(*raw['bn1'])
    s2, t2 = fold_bn(*raw['bn2'])
    p = {
        'stride': raw['stride'],
        'conv1': prep_conv(raw['conv1_w'], s1, t1),
        'conv2': prep_conv(raw['conv2_w'], s2, t2),
        'down': None,
    }
    if raw['down_w'] is not None:
        sd, td = fold_bn(*raw['bn_d'])
        p['down'] = prep_conv(raw['down_w'], sd, td)
    return p


# ----------------------------------------------------------------------------
# Pure-JAX reference (mirrors the bf16 operand casts) for correctness check
# ----------------------------------------------------------------------------
def ref_conv_bn(x, w, scale, shift, stride, relu, residual=None):
    kh = w.shape[2]
    pad = (kh - 1) // 2
    y = lax.conv_general_dilated(
        x.astype(jnp.bfloat16), w.astype(jnp.bfloat16),
        window_strides=(stride, stride),
        padding=[(pad, pad), (pad, pad)],
        dimension_numbers=('NHWC', 'OIHW', 'NHWC'),
        preferred_element_type=jnp.float32)
    y = y * scale + shift
    if residual is not None:
        y = y + residual
    if relu:
        y = jnp.maximum(y, 0.0)
    return y


def ref_basic_block(x, raw):
    s1, t1 = fold_bn(*raw['bn1'])
    s2, t2 = fold_bn(*raw['bn2'])
    stride = raw['stride']
    h = ref_conv_bn(x, raw['conv1_w'], s1, t1, stride, True)
    h = h.astype(jnp.bfloat16).astype(jnp.float32)   # mirror bf16 intermediate
    if raw['down_w'] is not None:
        sd, td = fold_bn(*raw['bn_d'])
        residual = ref_conv_bn(x, raw['down_w'], sd, td, stride, False)
    else:
        residual = x
    return ref_conv_bn(h, raw['conv2_w'], s2, t2, 1, True, residual)


# ----------------------------------------------------------------------------
# Main
# ----------------------------------------------------------------------------
if __name__ == "__main__":
    B, C, H, W = 2, 16, 16, 16
    PLANES = 32

    kg = KeyGen(0)
    # Block 1: stride 2 with 1x1-conv downsample; Block 2: stride 1, identity residual.
    raw1 = make_basicblock_raw(kg, C, PLANES, stride=2, downsample=True)
    raw2 = make_basicblock_raw(kg, PLANES, PLANES, stride=1, downsample=False)
    prep1 = prepare_basicblock(raw1)      # one-time weight layout / padding / bf16 cast
    prep2 = prepare_basicblock(raw2)

    x = jax.random.normal(jax.random.PRNGKey(0), (B, C, H, W), jnp.float32)

    fwd = jax.jit(lambda inp: two_block_forward(inp, prep1, prep2))
    y = fwd(x)
    jax.block_until_ready(y)

    assert y.shape == (B, PLANES, H // 2, W // 2)
    assert bool(jnp.all(jnp.isfinite(y)))

    # Correctness check vs. pure-JAX reference with the same bf16 operand casts.
    x_nhwc = jnp.transpose(x, (0, 2, 3, 1)).astype(jnp.float32)
    y_ref = ref_basic_block(ref_basic_block(x_nhwc, raw1), raw2)
    y_ref = jnp.transpose(y_ref, (0, 3, 1, 2))
    err = float(jnp.max(jnp.abs(y - y_ref)))
    assert err < 5e-2, f"max abs err vs reference: {err}"

    print("KERNEL_OK")
</pallas_src>

<mosaic_0001>
module attributes {stable_mosaic.version = 11 : i64} {
  func.func @kernel(%arg0: i32, %arg1: i32, %arg2: memref<128x256xbf16, #tpu.memory_space<vmem>>, %arg3: memref<256x128xbf16, #tpu.memory_space<vmem>>, %arg4: memref<1x128xf32, #tpu.memory_space<vmem>>, %arg5: memref<1x128xf32, #tpu.memory_space<vmem>>, %arg6: memref<128x128xbf16, #tpu.memory_space<vmem>>) attributes {dimension_semantics = [#tpu.dimension_semantics<parallel>, #tpu.dimension_semantics<parallel>], iteration_bounds = array<i64: 1, 1>, scalar_prefetch = 0 : i64, scratch_operands = 0 : i64, tpu.core_type = #tpu.core_type<tc>, window_params = [{transform_indices = @transform_0, window_bounds = array<i64: 128, 256>}, {transform_indices = @transform_1, window_bounds = array<i64: 256, 128>}, {transform_indices = @transform_2, window_bounds = array<i64: 1, 128>}, {transform_indices = @transform_3, window_bounds = array<i64: 1, 128>}, {transform_indices = @transform_4, window_bounds = array<i64: 128, 128>}]} {
    %c0 = arith.constant 0 : index
    %c0_0 = arith.constant 0 : index
    %0 = vector.load %arg2[%c0, %c0_0] : memref<128x256xbf16, #tpu.memory_space<vmem>>, vector<128x256xbf16>
    %c0_1 = arith.constant 0 : index
    %c0_2 = arith.constant 0 : index
    %1 = vector.load %arg3[%c0_1, %c0_2] : memref<256x128xbf16, #tpu.memory_space<vmem>>, vector<256x128xbf16>
    %cst = arith.constant dense<0.000000e+00> : vector<128x128xf32>
    %2 = tpu.matmul %0, %1, %cst {dimension_numbers = #tpu.dot_dimension_numbers<[1], [0], [0], [1], [0, 0, 1, 1], [], []>} : vector<128x256xbf16>, vector<256x128xbf16>, vector<128x128xf32> -> vector<128x128xf32>
    %c0_3 = arith.constant 0 : index
    %c0_4 = arith.constant 0 : index
    %3 = vector.load %arg4[%c0_3, %c0_4] : memref<1x128xf32, #tpu.memory_space<vmem>>, vector<1x128xf32>
    %4 = vector.broadcast %3 : vector<1x128xf32> to vector<128x128xf32>
    %5 = arith.mulf %2, %4 : vector<128x128xf32>
    %c0_5 = arith.constant 0 : index
    %c0_6 = arith.constant 0 : index
    %6 = vector.load %arg5[%c0_5, %c0_6] : memref<1x128xf32, #tpu.memory_space<vmem>>, vector<1x128xf32>
    %7 = vector.broadcast %6 : vector<1x128xf32> to vector<128x128xf32>
    %8 = arith.addf %5, %7 : vector<128x128xf32>
    %cst_7 = arith.constant 0.000000e+00 : f32
    %9 = vector.broadcast %cst_7 : f32 to vector<128x128xf32>
    %10 = arith.maximumf %8, %9 : vector<128x128xf32>
    %11 = arith.truncf %10 : vector<128x128xf32> to vector<128x128xbf16>
    %c0_8 = arith.constant 0 : index
    %c0_9 = arith.constant 0 : index
    %12 = vector.load %arg6[%c0_8, %c0_9] : memref<128x128xbf16, #tpu.memory_space<vmem>>, vector<128x128xbf16>
    tpu.vector_store %arg6[%c0_8, %c0_9], %11 {strides = array<i32>} : memref<128x128xbf16, #tpu.memory_space<vmem>>, vector<128x128xbf16>,
    return
  }
  func.func @transform_0(%arg0: i32, %arg1: i32) -> (i32, i32) {
    %c0_i32 = arith.constant 0 : i32
    %c0_i32_0 = arith.constant 0 : i32
    return %arg0, %c0_i32 : i32, i32
  }
  func.func @transform_1(%arg0: i32, %arg1: i32) -> (i32, i32) {
    %c0_i32 = arith.constant 0 : i32
    %c0_i32_0 = arith.constant 0 : i32
    return %c0_i32, %arg1 : i32, i32
  }
  func.func @transform_2(%arg0: i32, %arg1: i32) -> (i32, i32) {
    %c0_i32 = arith.constant 0 : i32
    %c0_i32_0 = arith.constant 0 : i32
    return %c0_i32, %arg1 : i32, i32
  }
  func.func @transform_3(%arg0: i32, %arg1: i32) -> (i32, i32) {
    %c0_i32 = arith.constant 0 : i32
    %c0_i32_0 = arith.constant 0 : i32
    return %c0_i32, %arg1 : i32, i32
  }
  func.func @transform_4(%arg0: i32, %arg1: i32) -> (i32, i32) {
    %c0_i32 = arith.constant 0 : i32
    return %arg0, %arg1 : i32, i32
  }
}

module attributes {stable_mosaic.version = 11 : i64} {
  func.func @kernel(%arg0: i32, %arg1: i32, %arg2: memref<128x384xbf16, #tpu.memory_space<vmem>>, %arg3: memref<384x128xbf16, #tpu.memory_space<vmem>>, %arg4: memref<1x128xf32, #tpu.memory_space<vmem>>, %arg5: memref<1x128xf32, #tpu.memory_space<vmem>>, %arg6: memref<128x128xbf16, #tpu.memory_space<vmem>>, %arg7: memref<128x128xbf16, #tpu.memory_space<vmem>>, %arg8: memref<1x128xf32, #tpu.memory_space<vmem>>, %arg9: memref<1x128xf32, #tpu.memory_space<vmem>>, %arg10: memref<128x128xf32, #tpu.memory_space<vmem>>) attributes {dimension_semantics = [#tpu.dimension_semantics<parallel>, #tpu.dimension_semantics<parallel>], iteration_bounds = array<i64: 1, 1>, scalar_prefetch = 0 : i64, scratch_operands = 0 : i64, tpu.core_type = #tpu.core_type<tc>, window_params = [{transform_indices = @transform_0, window_bounds = array<i64: 128, 384>}, {transform_indices = @transform_1, window_bounds = array<i64: 384, 128>}, {transform_indices = @transform_2, window_bounds = array<i64: 1, 128>}, {transform_indices = @transform_3, window_bounds = array<i64: 1, 128>}, {transform_indices = @transform_4, window_bounds = array<i64: 128, 128>}, {transform_indices = @transform_5, window_bounds = array<i64: 128, 128>}, {transform_indices = @transform_6, window_bounds = array<i64: 1, 128>}, {transform_indices = @transform_7, window_bounds = array<i64: 1, 128>}, {transform_indices = @transform_8, window_bounds = array<i64: 128, 128>}]} {
    %c0 = arith.constant 0 : index
    %c0_0 = arith.constant 0 : index
    %0 = vector.load %arg2[%c0, %c0_0] : memref<128x384xbf16, #tpu.memory_space<vmem>>, vector<128x384xbf16>
    %c0_1 = arith.constant 0 : index
    %c0_2 = arith.constant 0 : index
    %1 = vector.load %arg3[%c0_1, %c0_2] : memref<384x128xbf16, #tpu.memory_space<vmem>>, vector<384x128xbf16>
    %cst = arith.constant dense<0.000000e+00> : vector<128x128xf32>
    %2 = tpu.matmul %0, %1, %cst {dimension_numbers = #tpu.dot_dimension_numbers<[1], [0], [0], [1], [0, 0, 1, 1], [], []>} : vector<128x384xbf16>, vector<384x128xbf16>, vector<128x128xf32> -> vector<128x128xf32>
    %c0_3 = arith.constant 0 : index
    %c0_4 = arith.constant 0 : index
    %3 = vector.load %arg4[%c0_3, %c0_4] : memref<1x128xf32, #tpu.memory_space<vmem>>, vector<1x128xf32>
    %4 = vector.broadcast %3 : vector<1x128xf32> to vector<128x128xf32>
    %5 = arith.mulf %2, %4 : vector<128x128xf32>
    %c0_5 = arith.constant 0 : index
    %c0_6 = arith.constant 0 : index
    %6 = vector.load %arg5[%c0_5, %c0_6] : memref<1x128xf32, #tpu.memory_space<vmem>>, vector<1x128xf32>
    %7 = vector.broadcast %6 : vector<1x128xf32> to vector<128x128xf32>
    %8 = arith.addf %5, %7 : vector<128x128xf32>
    %c0_7 = arith.constant 0 : index
    %c0_8 = arith.constant 0 : index
    %9 = vector.load %arg6[%c0_7, %c0_8] : memref<128x128xbf16, #tpu.memory_space<vmem>>, vector<128x128xbf16>
    %c0_9 = arith.constant 0 : index
    %c0_10 = arith.constant 0 : index
    %10 = vector.load %arg7[%c0_9, %c0_10] : memref<128x128xbf16, #tpu.memory_space<vmem>>, vector<128x128xbf16>
    %cst_11 = arith.constant dense<0.000000e+00> : vector<128x128xf32>
    %11 = tpu.matmul %9, %10, %cst_11 {dimension_numbers = #tpu.dot_dimension_numbers<[1], [0], [0], [1], [0, 0, 1, 1], [], []>} : vector<128x128xbf16>, vector<128x128xbf16>, vector<128x128xf32> -> vector<128x128xf32>
    %c0_12 = arith.constant 0 : index
    %c0_13 = arith.constant 0 : index
    %12 = vector.load %arg8[%c0_12, %c0_13] : memref<1x128xf32, #tpu.memory_space<vmem>>, vector<1x128xf32>
    %13 = vector.broadcast %12 : vector<1x128xf32> to vector<128x128xf32>
    %14 = arith.mulf %11, %13 : vector<128x128xf32>
    %c0_14 = arith.constant 0 : index
    %c0_15 = arith.constant 0 : index
    %15 = vector.load %arg9[%c0_14, %c0_15] : memref<1x128xf32, #tpu.memory_space<vmem>>, vector<1x128xf32>
    %16 = vector.broadcast %15 : vector<1x128xf32> to vector<128x128xf32>
    %17 = arith.addf %14, %16 : vector<128x128xf32>
    %18 = arith.addf %8, %17 : vector<128x128xf32>
    %cst_16 = arith.constant 0.000000e+00 : f32
    %19 = vector.broadcast %cst_16 : f32 to vector<128x128xf32>
    %20 = arith.maximumf %18, %19 : vector<128x128xf32>
    %c0_17 = arith.constant 0 : index
    %c0_18 = arith.constant 0 : index
    %21 = vector.load %arg10[%c0_17, %c0_18] : memref<128x128xf32, #tpu.memory_space<vmem>>, vector<128x128xf32>
    tpu.vector_store %arg10[%c0_17, %c0_18], %20 {strides = array<i32>} : memref<128x128xf32, #tpu.memory_space<vmem>>, vector<128x128xf32>,
    return
  }
  func.func @transform_0(%arg0: i32, %arg1: i32) -> (i32, i32) {
    %c0_i32 = arith.constant 0 : i32
    %c0_i32_0 = arith.constant 0 : i32
    return %arg0, %c0_i32 : i32, i32
  }
  func.func @transform_1(%arg0: i32, %arg1: i32) -> (i32, i32) {
    %c0_i32 = arith.constant 0 : i32
    %c0_i32_0 = arith.constant 0 : i32
    return %c0_i32, %arg1 : i32, i32
  }
  func.func @transform_2(%arg0: i32, %arg1: i32) -> (i32, i32) {
    %c0_i32 = arith.constant 0 : i32
    %c0_i32_0 = arith.constant 0 : i32
    return %c0_i32, %arg1 : i32, i32
  }
  func.func @transform_3(%arg0: i32, %arg1: i32) -> (i32, i32) {
    %c0_i32 = arith.constant 0 : i32
    %c0_i32_0 = arith.constant 0 : i32
    return %c0_i32, %arg1 : i32, i32
  }
  func.func @transform_4(%arg0: i32, %arg1: i32) -> (i32, i32) {
    %c0_i32 = arith.constant 0 : i32
    %c0_i32_0 = arith.constant 0 : i32
    return %arg0, %c0_i32 : i32, i32
  }
  func.func @transform_5(%arg0: i32, %arg1: i32) -> (i32, i32) {
    %c0_i32 = arith.constant 0 : i32
    %c0_i32_0 = arith.constant 0 : i32
    return %c0_i32, %arg1 : i32, i32
  }
  func.func @transform_6(%arg0: i32, %arg1: i32) -> (i32, i32) {
    %c0_i32 = arith.constant 0 : i32
    %c0_i32_0 = arith.constant 0 : i32
    return %c0_i32, %arg1 : i32, i32
  }
  func.func @transform_7(%arg0: i32, %arg1: i32) -> (i32, i32) {
    %c0_i32 = arith.constant 0 : i32
    %c0_i32_0 = arith.constant 0 : i32
    return %c0_i32, %arg1 : i32, i32
  }
  func.func @transform_8(%arg0: i32, %arg1: i32) -> (i32, i32) {
    %c0_i32 = arith.constant 0 : i32
    return %arg0, %arg1 : i32, i32
  }
}

module attributes {stable_mosaic.version = 11 : i64} {
  func.func @kernel(%arg0: i32, %arg1: i32, %arg2: memref<128x384xbf16, #tpu.memory_space<vmem>>, %arg3: memref<384x128xbf16, #tpu.memory_space<vmem>>, %arg4: memref<1x128xf32, #tpu.memory_space<vmem>>, %arg5: memref<1x128xf32, #tpu.memory_space<vmem>>, %arg6: memref<128x128xbf16, #tpu.memory_space<vmem>>) attributes {dimension_semantics = [#tpu.dimension_semantics<parallel>, #tpu.dimension_semantics<parallel>], iteration_bounds = array<i64: 1, 1>, scalar_prefetch = 0 : i64, scratch_operands = 0 : i64, tpu.core_type = #tpu.core_type<tc>, window_params = [{transform_indices = @transform_0, window_bounds = array<i64: 128, 384>}, {transform_indices = @transform_1, window_bounds = array<i64: 384, 128>}, {transform_indices = @transform_2, window_bounds = array<i64: 1, 128>}, {transform_indices = @transform_3, window_bounds = array<i64: 1, 128>}, {transform_indices = @transform_4, window_bounds = array<i64: 128, 128>}]} {
    %c0 = arith.constant 0 : index
    %c0_0 = arith.constant 0 : index
    %0 = vector.load %arg2[%c0, %c0_0] : memref<128x384xbf16, #tpu.memory_space<vmem>>, vector<128x384xbf16>
    %c0_1 = arith.constant 0 : index
    %c0_2 = arith.constant 0 : index
    %1 = vector.load %arg3[%c0_1, %c0_2] : memref<384x128xbf16, #tpu.memory_space<vmem>>, vector<384x128xbf16>
    %cst = arith.constant dense<0.000000e+00> : vector<128x128xf32>
    %2 = tpu.matmul %0, %1, %cst {dimension_numbers = #tpu.dot_dimension_numbers<[1], [0], [0], [1], [0, 0, 1, 1], [], []>} : vector<128x384xbf16>, vector<384x128xbf16>, vector<128x128xf32> -> vector<128x128xf32>
    %c0_3 = arith.constant 0 : index
    %c0_4 = arith.constant 0 : index
    %3 = vector.load %arg4[%c0_3, %c0_4] : memref<1x128xf32, #tpu.memory_space<vmem>>, vector<1x128xf32>
    %4 = vector.broadcast %3 : vector<1x128xf32> to vector<128x128xf32>
    %5 = arith.mulf %2, %4 : vector<128x128xf32>
    %c0_5 = arith.constant 0 : index
    %c0_6 = arith.constant 0 : index
    %6 = vector.load %arg5[%c0_5, %c0_6] : memref<1x128xf32, #tpu.memory_space<vmem>>, vector<1x128xf32>
    %7 = vector.broadcast %6 : vector<1x128xf32> to vector<128x128xf32>
    %8 = arith.addf %5, %7 : vector<128x128xf32>
    %cst_7 = arith.constant 0.000000e+00 : f32
    %9 = vector.broadcast %cst_7 : f32 to vector<128x128xf32>
    %10 = arith.maximumf %8, %9 : vector<128x128xf32>
    %11 = arith.truncf %10 : vector<128x128xf32> to vector<128x128xbf16>
    %c0_8 = arith.constant 0 : index
    %c0_9 = arith.constant 0 : index
    %12 = vector.load %arg6[%c0_8, %c0_9] : memref<128x128xbf16, #tpu.memory_space<vmem>>, vector<128x128xbf16>
    tpu.vector_store %arg6[%c0_8, %c0_9], %11 {strides = array<i32>} : memref<128x128xbf16, #tpu.memory_space<vmem>>, vector<128x128xbf16>,
    return
  }
  func.func @transform_0(%arg0: i32, %arg1: i32) -> (i32, i32) {
    %c0_i32 = arith.constant 0 : i32
    %c0_i32_0 = arith.constant 0 : i32
    return %arg0, %c0_i32 : i32, i32
  }
  func.func @transform_1(%arg0: i32, %arg1: i32) -> (i32, i32) {
    %c0_i32 = arith.constant 0 : i32
    %c0_i32_0 = arith.constant 0 : i32
    return %c0_i32, %arg1 : i32, i32
  }
  func.func @transform_2(%arg0: i32, %arg1: i32) -> (i32, i32) {
    %c0_i32 = arith.constant 0 : i32
    %c0_i32_0 = arith.constant 0 : i32
    return %c0_i32, %arg1 : i32, i32
  }
  func.func @transform_3(%arg0: i32, %arg1: i32) -> (i32, i32) {
    %c0_i32 = arith.constant 0 : i32
    %c0_i32_0 = arith.constant 0 : i32
    return %c0_i32, %arg1 : i32, i32
  }
  func.func @transform_4(%arg0: i32, %arg1: i32) -> (i32, i32) {
    %c0_i32 = arith.constant 0 : i32
    return %arg0, %arg1 : i32, i32
  }
}

module attributes {stable_mosaic.version = 11 : i64} {
  func.func @kernel(%arg0: i32, %arg1: i32, %arg2: memref<128x384xbf16, #tpu.memory_space<vmem>>, %arg3: memref<384x128xbf16, #tpu.memory_space<vmem>>, %arg4: memref<1x128xf32, #tpu.memory_space<vmem>>, %arg5: memref<1x128xf32, #tpu.memory_space<vmem>>, %arg6: memref<128x128xf32, #tpu.memory_space<vmem>>, %arg7: memref<128x128xf32, #tpu.memory_space<vmem>>) attributes {dimension_semantics = [#tpu.dimension_semantics<parallel>, #tpu.dimension_semantics<parallel>], iteration_bounds = array<i64: 1, 1>, scalar_prefetch = 0 : i64, scratch_operands = 0 : i64, tpu.core_type = #tpu.core_type<tc>, window_params = [{transform_indices = @transform_0, window_bounds = array<i64: 128, 384>}, {transform_indices = @transform_1, window_bounds = array<i64: 384, 128>}, {transform_indices = @transform_2, window_bounds = array<i64: 1, 128>}, {transform_indices = @transform_3, window_bounds = array<i64: 1, 128>}, {transform_indices = @transform_4, window_bounds = array<i64: 128, 128>}, {transform_indices = @transform_5, window_bounds = array<i64: 128, 128>}]} {
    %c0 = arith.constant 0 : index
    %c0_0 = arith.constant 0 : index
    %0 = vector.load %arg2[%c0, %c0_0] : memref<128x384xbf16, #tpu.memory_space<vmem>>, vector<128x384xbf16>
    %c0_1 = arith.constant 0 : index
    %c0_2 = arith.constant 0 : index
    %1 = vector.load %arg3[%c0_1, %c0_2] : memref<384x128xbf16, #tpu.memory_space<vmem>>, vector<384x128xbf16>
    %cst = arith.constant dense<0.000000e+00> : vector<128x128xf32>
    %2 = tpu.matmul %0, %1, %cst {dimension_numbers = #tpu.dot_dimension_numbers<[1], [0], [0], [1], [0, 0, 1, 1], [], []>} : vector<128x384xbf16>, vector<384x128xbf16>, vector<128x128xf32> -> vector<128x128xf32>
    %c0_3 = arith.constant 0 : index
    %c0_4 = arith.constant 0 : index
    %3 = vector.load %arg4[%c0_3, %c0_4] : memref<1x128xf32, #tpu.memory_space<vmem>>, vector<1x128xf32>
    %4 = vector.broadcast %3 : vector<1x128xf32> to vector<128x128xf32>
    %5 = arith.mulf %2, %4 : vector<128x128xf32>
    %c0_5 = arith.constant 0 : index
    %c0_6 = arith.constant 0 : index
    %6 = vector.load %arg5[%c0_5, %c0_6] : memref<1x128xf32, #tpu.memory_space<vmem>>, vector<1x128xf32>
    %7 = vector.broadcast %6 : vector<1x128xf32> to vector<128x128xf32>
    %8 = arith.addf %5, %7 : vector<128x128xf32>
    %c0_7 = arith.constant 0 : index
    %c0_8 = arith.constant 0 : index
    %9 = vector.load %arg6[%c0_7, %c0_8] : memref<128x128xf32, #tpu.memory_space<vmem>>, vector<128x128xf32>
    %10 = arith.addf %8, %9 : vector<128x128xf32>
    %cst_9 = arith.constant 0.000000e+00 : f32
    %11 = vector.broadcast %cst_9 : f32 to vector<128x128xf32>
    %12 = arith.maximumf %10, %11 : vector<128x128xf32>
    %c0_10 = arith.constant 0 : index
    %c0_11 = arith.constant 0 : index
    %13 = vector.load %arg7[%c0_10, %c0_11] : memref<128x128xf32, #tpu.memory_space<vmem>>, vector<128x128xf32>
    tpu.vector_store %arg7[%c0_10, %c0_11], %12 {strides = array<i32>} : memref<128x128xf32, #tpu.memory_space<vmem>>, vector<128x128xf32>,
    return
  }
  func.func @transform_0(%arg0: i32, %arg1: i32) -> (i32, i32) {
    %c0_i32 = arith.constant 0 : i32
    %c0_i32_0 = arith.constant 0 : i32
    return %arg0, %c0_i32 : i32, i32
  }
  func.func @transform_1(%arg0: i32, %arg1: i32) -> (i32, i32) {
    %c0_i32 = arith.constant 0 : i32
    %c0_i32_0 = arith.constant 0 : i32
    return %c0_i32, %arg1 : i32, i32
  }
  func.func @transform_2(%arg0: i32, %arg1: i32) -> (i32, i32) {
    %c0_i32 = arith.constant 0 : i32
    %c0_i32_0 = arith.constant 0 : i32
    return %c0_i32, %arg1 : i32, i32
  }
  func.func @transform_3(%arg0: i32, %arg1: i32) -> (i32, i32) {
    %c0_i32 = arith.constant 0 : i32
    %c0_i32_0 = arith.constant 0 : i32
    return %c0_i32, %arg1 : i32, i32
  }
  func.func @transform_4(%arg0: i32, %arg1: i32) -> (i32, i32) {
    %c0_i32 = arith.constant 0 : i32
    return %arg0, %arg1 : i32, i32
  }
  func.func @transform_5(%arg0: i32, %arg1: i32) -> (i32, i32) {
    %c0_i32 = arith.constant 0 : i32
    return %arg0, %arg1 : i32, i32
  }
}

</mosaic_0001>

<bundles_post_ra>
// kernel: _lambda_.4
= control target key start
LH: loop header
LB: loop body
LE: loop exit
PB: predicated region body
PF: predicated region fallthrough
CT: control target
= control target key end

     0   :  { %s905_s1 = inlined_call_operand.vmem [shape: bf16[256,128], index: 1, kind: input, shape index: {}]   ;;  %s906_s0 = inlined_call_operand.vmem [shape: bf16[128,256], index: 0, kind: input, shape index: {}]   ;;  %s907_s2 = inlined_call_operand.vmem [shape: f32[1,128], index: 2, kind: input, shape index: {}]   ;;  %s908_s3 = inlined_call_operand.vmem [shape: f32[1,128], index: 3, kind: input, shape index: {}]   ;;  %s909_s4 = inlined_call_operand.vmem [shape: bf16[128,128], index: 4, kind: output, shape index: {}]  }
   0x1   :  { %v678_v0 = vld [vmem:[%s905_s1 + $0x40] sm:$0xff]   ;;  %v680_v2 = vld [vmem:[%s905_s1 + $0x48] sm:$0xff]   ;;  %v682_v4 = vld [vmem:[%s905_s1 + $0x50] sm:$0xff]  }
   0x2   :  { %v679_v1 = vld [vmem:[%s905_s1] sm:$0xff]   ;;  %598 = vmatprep.subr.bf16.mxu0 %v678_v0  ;;  %662 = vmatprep.subr.bf16.mxu1 %v678_v0  ;;  %v681_v3 = vld [vmem:[%s905_s1 + $0x8] sm:$0xff]   ;;  %v683_v5 = vld [vmem:[%s905_s1 + $0x10] sm:$0xff]  }
   0x3   :  { %599 = vmatpush3.bf16.msra.mxu0 %v679_v1  ;;  %670 = vmatpush3.bf16.msra.mxu1 %v679_v1  ;;  %v684_v6 = vld [vmem:[%s905_s1 + $0x58] sm:$0xff]   ;;  %v686_v8 = vld [vmem:[%s905_s1 + $0x60] sm:$0xff]   ;;  %v688_v10 = vld [vmem:[%s905_s1 + $0x68] sm:$0xff]  }
   0x4   :  { %600 = vmatprep.subr.bf16.mxu0 %v680_v2  ;;  %663 = vmatprep.subr.bf16.mxu1 %v680_v2  ;;  %v685_v7 = vld [vmem:[%s905_s1 + $0x18] sm:$0xff]   ;;  %v687_v9 = vld [vmem:[%s905_s1 + $0x20] sm:$0xff]   ;;  %v689_v13 = vld [vmem:[%s905_s1 + $0x28] sm:$0xff]  }
   0x5   :  { %v696_v11 = vld [vmem:[%s906_s0 + $0x4] ss:$8 sps:$4 sm:$0xff]   ;;  %v690_v14 = vld [vmem:[%s905_s1 + $0x70] sm:$0xff]   ;;  %v692_v16 = vld [vmem:[%s905_s1 + $0x78] sm:$0xff]  }
   0x6   :  { %v699_v12 = vld [vmem:[%s906_s0 + $0x44] ss:$8 sps:$4 sm:$0xff]   ;;  %274 = vmatprep.mubr.bf16.mxu0 %v696_v11  ;;  %v691_v15 = vld [vmem:[%s905_s1 + $0x30] sm:$0xff]   ;;  %v693_v17 = vld [vmem:[%s905_s1 + $0x38] sm:$0xff]  }
   0x7   :  { %601 = vmatpush3.bf16.msra.mxu0 %v681_v3  ;;  %671 = vmatpush3.bf16.msra.mxu1 %v681_v3  ;;  %v694_v18 = vld [vmem:[%s906_s0] ss:$8 sps:$4 sm:$0xff]   ;;  %v700_v20 = vld [vmem:[%s906_s0 + $0x14] ss:$8 sps:$4 sm:$0xff]   ;;  %v704_v22 = vld [vmem:[%s906_s0 + $0x10] ss:$8 sps:$4 sm:$0xff]  }
   0x8   :  { %602 = vmatprep.subr.bf16.mxu0 %v682_v4  ;;  %664 = vmatprep.subr.bf16.mxu1 %v682_v4  ;;  %v697_v19 = vld [vmem:[%s906_s0 + $0x40] ss:$8 sps:$4 sm:$0xff]   ;;  %v702_v21 = vld [vmem:[%s906_s0 + $0x54] ss:$8 sps:$4 sm:$0xff]   ;;  %v705_v23 = vld [vmem:[%s906_s0 + $0x50] ss:$8 sps:$4 sm:$0xff]  }
   0x9   :  { %306 = vmatprep.mubr.bf16.mxu1 %v699_v12  ;;  %v706_v24 = vld [vmem:[%s906_s0 + $0x24] ss:$8 sps:$4 sm:$0xff]   ;;  %v710_v26 = vld [vmem:[%s906_s0 + $0x20] ss:$8 sps:$4 sm:$0xff]   ;;  %v712_v28 = vld [vmem:[%s906_s0 + $0x34] ss:$8 sps:$4 sm:$0xff]  }
   0xa   :  { %v708_v25 = vld [vmem:[%s906_s0 + $0x64] ss:$8 sps:$4 sm:$0xff]   ;;  %v711_v27 = vld [vmem:[%s906_s0 + $0x60] ss:$8 sps:$4 sm:$0xff]   ;;  %v714_v29 = vld [vmem:[%s906_s0 + $0x74] ss:$8 sps:$4 sm:$0xff]  }
   0xb   :  { %603 = vmatpush3.bf16.msra.mxu0 %v683_v5  ;;  %672 = vmatpush3.bf16.msra.mxu1 %v683_v5  ;;  %v716_v30 = vld [vmem:[%s906_s0 + $0x30] ss:$8 sps:$4 sm:$0xff]   ;;  %v842_v35 = vld [vmem:[%s907_s2] ss:$0 sm:$0xff] }
   0xc   :  { %604 = vmatprep.subr.bf16.mxu0 %v684_v6  ;;  %665 = vmatprep.subr.bf16.mxu1 %v684_v6  ;;  %v717_v31 = vld [vmem:[%s906_s0 + $0x70] ss:$8 sps:$4 sm:$0xff]   ;;  %v847_v41 = vld [vmem:[%s908_s3] ss:$0 sm:$0xff] }
   0xf   :  { %605 = vmatpush3.bf16.msra.mxu0 %v685_v7  ;;  %673 = vmatpush3.bf16.msra.mxu1 %v685_v7 }
  0x10   :  { %606 = vmatprep.subr.bf16.mxu0 %v686_v8  ;;  %666 = vmatprep.subr.bf16.mxu1 %v686_v8 }
  0x13   :  { %607 = vmatpush3.bf16.msra.mxu0 %v687_v9  ;;  %674 = vmatpush3.bf16.msra.mxu1 %v687_v9 }
  0x14   :  { %608 = vmatprep.subr.bf16.mxu0 %v688_v10  ;;  %667 = vmatprep.subr.bf16.mxu1 %v688_v10 }
  0x17   :  { %609 = vmatpush3.bf16.msra.mxu0 %v689_v13  ;;  %675 = vmatpush3.bf16.msra.mxu1 %v689_v13 }
  0x18   :  { %610 = vmatprep.subr.bf16.mxu0 %v690_v14  ;;  %668 = vmatprep.subr.bf16.mxu1 %v690_v14 }
  0x1b   :  { %611 = vmatpush3.bf16.msra.mxu0 %v691_v15  ;;  %676 = vmatpush3.bf16.msra.mxu1 %v691_v15 }
  0x1c   :  { %612 = vmatprep.subr.bf16.mxu0 %v692_v16  ;;  %669 = vmatprep.subr.bf16.mxu1 %v692_v16 }
  0x1f   :  { %613 = vmatpush3.bf16.msra.mxu0 %v693_v17  ;;  %677 = vmatpush3.bf16.msra.mxu1 %v693_v17 }
  0x22   :  { %275 = vmatmul.mubr.bf16.vlgmr.msra.gmra.mrb[0].mxu0 %v694_v18  ;;  %307 = vmatmul.mubr.bf16.vlgmr.msra.gmra.mrb[0].mxu1 %v697_v19 }
  0x23   :  { %282 = vmatprep.mubr.bf16.mxu0 %v700_v20  ;;  %314 = vmatprep.mubr.bf16.mxu1 %v702_v21 }
  0x2a   :  { %283 = vmatmul.mubr.bf16.gmra.mrb[4].mxu0 %v704_v22  ;;  %315 = vmatmul.mubr.bf16.gmra.mrb[4].mxu1 %v705_v23 }
  0x2b   :  { %290 = vmatprep.mubr.bf16.mxu0 %v706_v24  ;;  %322 = vmatprep.mubr.bf16.mxu1 %v708_v25 }
  0x32   :  { %291 = vmatmul.mubr.bf16.gmra.mrb[8].mxu0 %v710_v26  ;;  %323 = vmatmul.mubr.bf16.gmra.mrb[8].mxu1 %v711_v27 }
  0x33   :  { %298 = vmatprep.mubr.bf16.mxu0 %v712_v28  ;;  %330 = vmatprep.mubr.bf16.mxu1 %v714_v29 }
  0x3a   :  { %299 = vmatmul.mubr.bf16.gmra.mrb[12].mxu0 %v716_v30  ;;  %331 = vmatmul.mubr.bf16.gmra.mrb[12].mxu1 %v717_v31 }
  0xf5   :  { %v614_v32 = vpop.f32.mrb[0].mxu0  ;;  %v638_v33 = vpop.f32.mrb[0].mxu1 }
  0xf6   :  { %v615_v34 = vpop.f32.mrb[1].mxu0  ;;  %v639_v36 = vpop.f32.mrb[1].mxu1 }
  0xf7   :  { %v616_v37 = vadd.f32 %v615_v34, %v614_v32  ;;  %v640_v38 = vadd.f32 %v639_v36, %v638_v33  ;;  %v617_v39 = vpop.f32.mrb[2].mxu0  ;;  %v641_v40 = vpop.f32.mrb[2].mxu1 }
  0xf8   :  { %v618_v42 = vpop.f32.mrb[3].mxu0  ;;  %v642_v43 = vpop.f32.mrb[3].mxu1 }
  0xf9   :  { %v346_v44 = vmul.f32 %v616_v37, %v842_v35  ;;  %v354_v45 = vmul.f32 %v640_v38, %v842_v35  ;;  %v619_v46 = vadd.f32 %v618_v42, %v617_v39  ;;  %v643_v47 = vadd.f32 %v642_v43, %v641_v40 }
  0xfb   :  { %v369_v48 = vadd.f32 %v847_v41, %v346_v44  ;;  %v377_v49 = vadd.f32 %v847_v41, %v354_v45  ;;  %v347_v50 = vmul.f32 %v619_v46, %v842_v35  ;;  %v355_v51 = vmul.f32 %v643_v47, %v842_v35 }
  0xfd   :  { %v370_v52 = vadd.f32 %v847_v41, %v347_v50  ;;  %v378_v53 = vadd.f32 %v847_v41, %v355_v51  ;;  %v620_v54 = vpop.f32.mrb[4].mxu0  ;;  %v644_v55 = vpop.f32.mrb[4].mxu1  ;;  %v385_v56 = vmax.f32 %v369_v48, 0.0  ;;  %v393_v57 = vmax.f32 %v377_v49, 0.0 }
  0xfe   :  { %v621_v58 = vpop.f32.mrb[5].mxu0  ;;  %v645_v59 = vpop.f32.mrb[5].mxu1 }
  0xff   :  { %v386_v60 = vmax.f32 %v370_v52, 0.0  ;;  %v394_v61 = vmax.f32 %v378_v53, 0.0  ;;  %v622_v62 = vadd.f32 %v621_v58, %v620_v54  ;;  %v646_v63 = vadd.f32 %v645_v59, %v644_v55  ;;  %v623_v0 = vpop.f32.mrb[6].mxu0  ;;  %v647_v1 = vpop.f32.mrb[6].mxu1 }
 0x100   :  { %v624_v2 = vpop.f32.mrb[7].mxu0  ;;  %v648_v3 = vpop.f32.mrb[7].mxu1 }
 0x101   :  { %v554_v4 = vpack.c.bf16 %v386_v60, %v385_v56  ;;  %v574_v5 = vpack.c.bf16 %v394_v61, %v393_v57  ;;  %v348_v6 = vmul.f32 %v622_v62, %v842_v35  ;;  %v356_v7 = vmul.f32 %v646_v63, %v842_v35 }
 0x102   :  { %v625_v8 = vadd.f32 %v624_v2, %v623_v0  ;;  %v649_v9 = vadd.f32 %v648_v3, %v647_v1 }
 0x103   :  { %555 = vst [vmem:[%s909_s4] sm:$0xff] %v554_v4   ;;  %594 = vst [vmem:[%s909_s4 + $0x20] sm:$0xff] %v574_v5   ;;  %v371_v10 = vadd.f32 %v847_v41, %v348_v6  ;;  %v379_v11 = vadd.f32 %v847_v41, %v356_v7 }
 0x104   :  { %v349_v12 = vmul.f32 %v625_v8, %v842_v35  ;;  %v357_v13 = vmul.f32 %v649_v9, %v842_v35 }
 0x105   :  { %v626_v14 = vpop.f32.mrb[8].mxu0  ;;  %v650_v15 = vpop.f32.mrb[8].mxu1  ;;  %v387_v24 = vmax.f32 %v371_v10, 0.0  ;;  %v395_v25 = vmax.f32 %v379_v11, 0.0 }
 0x106   :  { %v372_v16 = vadd.f32 %v847_v41, %v349_v12  ;;  %v380_v17 = vadd.f32 %v847_v41, %v357_v13  ;;  %v627_v18 = vpop.f32.mrb[9].mxu0  ;;  %v651_v19 = vpop.f32.mrb[9].mxu1 }
 0x107   :  { %v628_v20 = vadd.f32 %v627_v18, %v626_v14  ;;  %v652_v21 = vadd.f32 %v651_v19, %v650_v15  ;;  %v629_v22 = vpop.f32.mrb[10].mxu0  ;;  %v653_v23 = vpop.f32.mrb[10].mxu1 }
 0x108   :  { %v388_v26 = vmax.f32 %v372_v16, 0.0  ;;  %v396_v27 = vmax.f32 %v380_v17, 0.0  ;;  %v630_v28 = vpop.f32.mrb[11].mxu0  ;;  %v654_v29 = vpop.f32.mrb[11].mxu1 }
 0x109   :  { %v350_v30 = vmul.f32 %v628_v20, %v842_v35  ;;  %v358_v31 = vmul.f32 %v652_v21, %v842_v35  ;;  %v631_v32 = vadd.f32 %v630_v28, %v629_v22  ;;  %v655_v33 = vadd.f32 %v654_v29, %v653_v23 }
 0x10a   :  { %v559_v34 = vpack.c.bf16 %v388_v26, %v387_v24  ;;  %v579_v36 = vpack.c.bf16 %v396_v27, %v395_v25 }
 0x10b   :  { %v373_v37 = vadd.f32 %v847_v41, %v350_v30  ;;  %v381_v38 = vadd.f32 %v847_v41, %v358_v31  ;;  %v351_v39 = vmul.f32 %v631_v32, %v842_v35  ;;  %v359_v40 = vmul.f32 %v655_v33, %v842_v35 }
 0x10c   :  { %591 = vst [vmem:[%s909_s4 + $0x8] sm:$0xff] %v559_v34   ;;  %595 = vst [vmem:[%s909_s4 + $0x28] sm:$0xff] %v579_v36  }
 0x10d   :  { %v374_v42 = vadd.f32 %v847_v41, %v351_v39  ;;  %v382_v43 = vadd.f32 %v847_v41, %v359_v40  ;;  %v632_v44 = vpop.f32.mrb[12].mxu0  ;;  %v656_v45 = vpop.f32.mrb[12].mxu1  ;;  %v389_v46 = vmax.f32 %v373_v37, 0.0  ;;  %v397_v47 = vmax.f32 %v381_v38, 0.0 }
 0x10e   :  { %v633_v48 = vpop.f32.mrb[13].mxu0  ;;  %v657_v49 = vpop.f32.mrb[13].mxu1 }
 0x10f   :  { %v390_v50 = vmax.f32 %v374_v42, 0.0  ;;  %v398_v51 = vmax.f32 %v382_v43, 0.0  ;;  %v634_v52 = vadd.f32 %v633_v48, %v632_v44  ;;  %v658_v53 = vadd.f32 %v657_v49, %v656_v45  ;;  %v635_v54 = vpop.f32.mrb[14].mxu0  ;;  %v659_v55 = vpop.f32.mrb[14].mxu1 }
 0x110   :  { %v636_v56 = vpop.f32.mrb[15].mxu0  ;;  %v660_v57 = vpop.f32.mrb[15].mxu1 }
 0x111   :  { %v564_v58 = vpack.c.bf16 %v390_v50, %v389_v46  ;;  %v584_v59 = vpack.c.bf16 %v398_v51, %v397_v47  ;;  %v352_v60 = vmul.f32 %v634_v52, %v842_v35  ;;  %v360_v61 = vmul.f32 %v658_v53, %v842_v35 }
 0x112   :  { %v637_v62 = vadd.f32 %v636_v56, %v635_v54  ;;  %v661_v63 = vadd.f32 %v660_v57, %v659_v55 }
 0x113   :  { %592 = vst [vmem:[%s909_s4 + $0x10] sm:$0xff] %v564_v58   ;;  %596 = vst [vmem:[%s909_s4 + $0x30] sm:$0xff] %v584_v59   ;;  %v375_v0 = vadd.f32 %v847_v41, %v352_v60  ;;  %v383_v1 = vadd.f32 %v847_v41, %v360_v61 }
 0x114   :  { %v353_v2 = vmul.f32 %v637_v62, %v842_v35  ;;  %v361_v3 = vmul.f32 %v661_v63, %v842_v35 }
 0x115   :  { %v391_v6 = vmax.f32 %v375_v0, 0.0  ;;  %v399_v7 = vmax.f32 %v383_v1, 0.0 }
 0x116   :  { %v376_v4 = vadd.f32 %v847_v41, %v353_v2  ;;  %v384_v5 = vadd.f32 %v847_v41, %v361_v3 }
 0x118   :  { %v392_v8 = vmax.f32 %v376_v4, 0.0  ;;  %v400_v9 = vmax.f32 %v384_v5, 0.0 }
 0x11a   :  { %v569_v10 = vpack.c.bf16 %v392_v8, %v391_v6  ;;  %v589_v11 = vpack.c.bf16 %v400_v9, %v399_v7 }
 0x11c   :  { %593 = vst [vmem:[%s909_s4 + $0x18] sm:$0xff] %v569_v10   ;;  %597 = vst [vmem:[%s909_s4 + $0x38] sm:$0xff] %v589_v11  }

// kernel: _lambda_.5
= control target key start
LH: loop header
LB: loop body
LE: loop exit
PB: predicated region body
PF: predicated region fallthrough
CT: control target
= control target key end

     0   :  { %s1635_s1 = inlined_call_operand.vmem [shape: bf16[384,128], index: 1, kind: input, shape index: {}]   ;;  %s1636_s0 = inlined_call_operand.vmem [shape: bf16[128,384], index: 0, kind: input, shape index: {}]   ;;  %s1637_s5 = inlined_call_operand.vmem [shape: bf16[128,128], index: 5, kind: input, shape index: {}]   ;;  %s1638_s4 = inlined_call_operand.vmem [shape: bf16[128,128], index: 4, kind: input, shape index: {}]   ;;  %s1639_s2 = inlined_call_operand.vmem [shape: f32[1,128], index: 2, kind: input, shape index: {}]   ;;  %s1640_s6 = inlined_call_operand.vmem [shape: f32[1,128], index: 6, kind: input, shape index: {}]   ;;  %s1641_s3 = inlined_call_operand.vmem [shape: f32[1,128], index: 3, kind: input, shape index: {}]   ;;  %s1642_s7 = inlined_call_operand.vmem [shape: f32[1,128], index: 7, kind: input, shape index: {}]   ;;  %s1643_s8 = inlined_call_operand.vmem [shape: f32[128,128], index: 8, kind: output, shape index: {}]  }
   0x1   :  { %v1173_v0 = vld [vmem:[%s1635_s1 + $0x40] sm:$0xff]   ;;  %v1176_v3 = vld [vmem:[%s1635_s1 + $0x48] sm:$0xff]   ;;  %v1179_v6 = vld [vmem:[%s1635_s1 + $0x50] sm:$0xff]  }
   0x2   :  { %v1174_v1 = vld [vmem:[%s1635_s1 + $0x80] sm:$0xff]   ;;  %1013 = vmatprep.subr.bf16.mxu0 %v1173_v0  ;;  %v1177_v4 = vld [vmem:[%s1635_s1 + $0x88] sm:$0xff]   ;;  %v1180_v7 = vld [vmem:[%s1635_s1 + $0x90] sm:$0xff]  }
   0x3   :  { %v1175_v2 = vld [vmem:[%s1635_s1] sm:$0xff]   ;;  %1109 = vmatprep.subr.bf16.mxu1 %v1174_v1  ;;  %v1178_v5 = vld [vmem:[%s1635_s1 + $0x8] sm:$0xff]   ;;  %v1181_v8 = vld [vmem:[%s1635_s1 + $0x10] sm:$0xff]  }
   0x4   :  { %1014 = vmatpush3.bf16.msra.mxu0 %v1175_v2  ;;  %1110 = vmatpush3.bf16.msra.mxu1 %v1174_v1  ;;  %v1182_v9 = vld [vmem:[%s1635_s1 + $0x58] sm:$0xff]   ;;  %v1185_v12 = vld [vmem:[%s1635_s1 + $0x60] sm:$0xff]   ;;  %v1188_v15 = vld [vmem:[%s1635_s1 + $0x68] sm:$0xff]  }
   0x5   :  { %1015 = vmatprep.subr.bf16.mxu0 %v1176_v3  ;;  %1111 = vmatprep.subr.bf16.mxu1 %v1177_v4  ;;  %v1183_v10 = vld [vmem:[%s1635_s1 + $0x98] sm:$0xff]   ;;  %v1186_v13 = vld [vmem:[%s1635_s1 + $0xa0] sm:$0xff]   ;;  %v1189_v16 = vld [vmem:[%s1635_s1 + $0xa8] sm:$0xff]  }
   0x6   :  { %v1184_v11 = vld [vmem:[%s1635_s1 + $0x18] sm:$0xff]   ;;  %v1187_v14 = vld [vmem:[%s1635_s1 + $0x20] sm:$0xff]   ;;  %v1190_v17 = vld [vmem:[%s1635_s1 + $0x28] sm:$0xff]  }
   0x7   :  { %v1191_v18 = vld [vmem:[%s1635_s1 + $0x70] sm:$0xff]   ;;  %v1194_v21 = vld [vmem:[%s1635_s1 + $0x78] sm:$0xff]   ;;  %v1202_v26 = vld [vmem:[%s1637_s5] sm:$0xff]  }
   0x8   :  { %1016 = vmatpush3.bf16.msra.mxu0 %v1178_v5  ;;  %1112 = vmatpush3.bf16.msra.mxu1 %v1177_v4  ;;  %v1192_v19 = vld [vmem:[%s1635_s1 + $0xb0] sm:$0xff]   ;;  %v1195_v22 = vld [vmem:[%s1635_s1 + $0xb8] sm:$0xff]   ;;  %v1197_v27 = vld [vmem:[%s1636_s0] ss:$12 sps:$4 sm:$0xff]  }
   0x9   :  { %1017 = vmatprep.subr.bf16.mxu0 %v1179_v6  ;;  %1113 = vmatprep.subr.bf16.mxu1 %v1180_v7  ;;  %v1193_v20 = vld [vmem:[%s1635_s1 + $0x30] sm:$0xff]   ;;  %v1196_v25 = vld [vmem:[%s1635_s1 + $0x38] sm:$0xff]   ;;  %v1201_v28 = vld [vmem:[%s1636_s0 + $0x20] ss:$12 sps:$4 sm:$0xff]  }
   0xa   :  { %v1199_v23 = vld [vmem:[%s1636_s0 + $0x4] ss:$12 sps:$4 sm:$0xff]   ;;  %v1200_v24 = vld [vmem:[%s1636_s0 + $0x8] ss:$12 sps:$4 sm:$0xff]   ;;  %v1210_v35 = vld [vmem:[%s1637_s5 + $0x18] sm:$0xff]  }
   0xb   :  { %414 = vmatprep.mubr.bf16.mxu0 %v1199_v23  ;;  %1125 = vmatprep.mubr.bf16.mxu1 %v1200_v24  ;;  %v1203_v29 = vld [vmem:[%s1637_s5 + $0x8] sm:$0xff]   ;;  %v1206_v31 = vld [vmem:[%s1636_s0 + $0x38] ss:$12 sps:$4 sm:$0xff]   ;;  %v1209_v33 = vld [vmem:[%s1637_s5 + $0x10] sm:$0xff]  }
   0xc   :  { %1018 = vmatpush3.bf16.msra.mxu0 %v1181_v8  ;;  %1114 = vmatpush3.bf16.msra.mxu1 %v1180_v7  ;;  %v1204_v30 = vld [vmem:[%s1636_s0 + $0x1c] ss:$12 sps:$4 sm:$0xff]   ;;  %v1207_v32 = vld [vmem:[%s1636_s0 + $0x18] ss:$12 sps:$4 sm:$0xff]   ;;  %v1211_v36 = vld [vmem:[%s1636_s0 + $0x34] ss:$12 sps:$4 sm:$0xff]  }
   0xd   :  { %1019 = vmatprep.subr.bf16.mxu0 %v1182_v9  ;;  %1115 = vmatprep.subr.bf16.mxu1 %v1183_v10  ;;  %v1208_v34 = vld [vmem:[%s1636_s0 + $0x50] ss:$12 sps:$4 sm:$0xff]   ;;  %v1213_v37 = vld [vmem:[%s1636_s0 + $0x68] ss:$12 sps:$4 sm:$0xff]   ;;  %v1216_v38 = vld [vmem:[%s1637_s5 + $0x20] sm:$0xff]  }
   0xe   :  { %v1214_v39 = vld [vmem:[%s1636_s0 + $0x30] ss:$12 sps:$4 sm:$0xff]   ;;  %v1215_v40 = vld [vmem:[%s1636_s0 + $0x80] ss:$12 sps:$4 sm:$0xff]   ;;  %v1220_v43 = vld [vmem:[%s1636_s0 + $0x98] ss:$12 sps:$4 sm:$0xff]  }
   0xf   :  { %v1217_v41 = vld [vmem:[%s1637_s5 + $0x28] sm:$0xff]   ;;  %v1223_v44 = vld [vmem:[%s1637_s5 + $0x30] sm:$0xff]   ;;  %v1224_v48 = vld [vmem:[%s1637_s5 + $0x38] sm:$0xff]  }
  0x10   :  { %1020 = vmatpush3.bf16.msra.mxu0 %v1184_v11  ;;  %1116 = vmatpush3.bf16.msra.mxu1 %v1183_v10  ;;  %v1218_v42 = vld [vmem:[%s1636_s0 + $0x4c] ss:$12 sps:$4 sm:$0xff]   ;;  %v1221_v45 = vld [vmem:[%s1636_s0 + $0x48] ss:$12 sps:$4 sm:$0xff]   ;;  %v1222_v46 = vld [vmem:[%s1636_s0 + $0xb0] ss:$12 sps:$4 sm:$0xff]  }
  0x11   :  { %1021 = vmatprep.subr.bf16.mxu0 %v1185_v12  ;;  %1117 = vmatprep.subr.bf16.mxu1 %v1186_v13  ;;  %v1225_v47 = vld [vmem:[%s1636_s0 + $0x64] ss:$12 sps:$4 sm:$0xff]   ;;  %v1228_v50 = vld [vmem:[%s1636_s0 + $0x60] ss:$12 sps:$4 sm:$0xff]   ;;  %v1230_v52 = vld [vmem:[%s1636_s0 + $0x7c] ss:$12 sps:$4 sm:$0xff]  }
  0x12   :  { %v1227_v49 = vld [vmem:[%s1638_s4] sm:$0xff]   ;;  %v1229_v51 = vld [vmem:[%s1638_s4 + $0x8] sm:$0xff]   ;;  %v1232_v53 = vld [vmem:[%s1638_s4 + $0x10] sm:$0xff]  }
  0x13   :  { %v1233_v54 = vld [vmem:[%s1636_s0 + $0x78] ss:$12 sps:$4 sm:$0xff]   ;;  %v1235_v56 = vld [vmem:[%s1636_s0 + $0x94] ss:$12 sps:$4 sm:$0xff]   ;;  %v1238_v58 = vld [vmem:[%s1636_s0 + $0x90] ss:$12 sps:$4 sm:$0xff]  }
  0x14   :  { %1022 = vmatpush3.bf16.msra.mxu0 %v1187_v14  ;;  %1118 = vmatpush3.bf16.msra.mxu1 %v1186_v13  ;;  %v1234_v55 = vld [vmem:[%s1638_s4 + $0x18] sm:$0xff]   ;;  %v1237_v57 = vld [vmem:[%s1638_s4 + $0x20] sm:$0xff]   ;;  %v1239_v59 = vld [vmem:[%s1638_s4 + $0x28] sm:$0xff]  }
  0x15   :  { %1023 = vmatprep.subr.bf16.mxu0 %v1188_v15  ;;  %1119 = vmatprep.subr.bf16.mxu1 %v1189_v16  ;;  %v1240_v60 = vld [vmem:[%s1636_s0 + $0xac] ss:$12 sps:$4 sm:$0xff]   ;;  %v1242_v61 = vld [vmem:[%s1638_s4 + $0x30] sm:$0xff]  }
  0x16   :  { %v1243_v62 = vld [vmem:[%s1636_s0 + $0xa8] ss:$12 sps:$4 sm:$0xff]   ;;  %v1244_v63 = vld [vmem:[%s1638_s4 + $0x38] sm:$0xff]  }
  0x18   :  { %1024 = vmatpush3.bf16.msra.mxu0 %v1190_v17  ;;  %1120 = vmatpush3.bf16.msra.mxu1 %v1189_v16 }
  0x19   :  { %1025 = vmatprep.subr.bf16.mxu0 %v1191_v18  ;;  %1121 = vmatprep.subr.bf16.mxu1 %v1192_v19 }
  0x1c   :  { %1026 = vmatpush3.bf16.msra.mxu0 %v1193_v20  ;;  %1122 = vmatpush3.bf16.msra.mxu1 %v1192_v19 }
  0x1d   :  { %1027 = vmatprep.subr.bf16.mxu0 %v1194_v21  ;;  %1123 = vmatprep.subr.bf16.mxu1 %v1195_v22 }
  0x20   :  { %1028 = vmatpush3.bf16.msra.mxu0 %v1196_v25  ;;  %1124 = vmatpush3.bf16.msra.mxu1 %v1195_v22 }
  0x21   :  { %1141 = vmatprep.subr.bf16.mxu1 %v1202_v26 }
  0x23   :  { %415 = vmatmul.mubr.bf16.vlgmr.msra.gmra.mrb[0].mxu0 %v1197_v27  ;;  %1126 = vmatmul.mubr.bf16.vlgmr.msra.gmra.mrb[0].mxu1 %v1201_v28 }
  0x24   :  { %1142 = vmatpush3.bf16.msra.mxu1 %v1202_v26  ;;  %422 = vmatprep.mubr.bf16.mxu0 %v1204_v30 }
  0x25   :  { %1143 = vmatprep.subr.bf16.mxu1 %v1203_v29  ;;  %1129 = vmatprep.mubr.bf16.mxu1 %v1206_v31 }
  0x28   :  { %1144 = vmatpush3.bf16.msra.mxu1 %v1203_v29 }
  0x29   :  { %1145 = vmatprep.subr.bf16.mxu1 %v1209_v33 }
  0x2b   :  { %423 = vmatmul.mubr.bf16.gmra.mrb[4].mxu0 %v1207_v32  ;;  %1130 = vmatmul.mubr.bf16.gmra.mrb[4].mxu1 %v1208_v34 }
  0x2c   :  { %1146 = vmatpush3.bf16.msra.mxu1 %v1209_v33  ;;  %430 = vmatprep.mubr.bf16.mxu0 %v1211_v36 }
  0x2d   :  { %1147 = vmatprep.subr.bf16.mxu1 %v1210_v35  ;;  %1133 = vmatprep.mubr.bf16.mxu1 %v1213_v37 }
  0x30   :  { %1148 = vmatpush3.bf16.msra.mxu1 %v1210_v35 }
  0x31   :  { %1149 = vmatprep.subr.bf16.mxu1 %v1216_v38 }
  0x33   :  { %431 = vmatmul.mubr.bf16.gmra.mrb[8].mxu0 %v1214_v39  ;;  %1134 = vmatmul.mubr.bf16.gmra.mrb[8].mxu1 %v1215_v40 }
  0x34   :  { %1150 = vmatpush3.bf16.msra.mxu1 %v1216_v38  ;;  %438 = vmatprep.mubr.bf16.mxu0 %v1218_v42 }
  0x35   :  { %1151 = vmatprep.subr.bf16.mxu1 %v1217_v41  ;;  %1137 = vmatprep.mubr.bf16.mxu1 %v1220_v43 }
  0x38   :  { %1152 = vmatpush3.bf16.msra.mxu1 %v1217_v41 }
  0x39   :  { %1153 = vmatprep.subr.bf16.mxu1 %v1223_v44 }
  0x3b   :  { %439 = vmatmul.mubr.bf16.gmra.mrb[12].mxu0 %v1221_v45  ;;  %1138 = vmatmul.mubr.bf16.gmra.mrb[12].mxu1 %v1222_v46  ;;  %v1499_v45 = vld [vmem:[%s1639_s2] ss:$0 sm:$0xff] }
  0x3c   :  { %1154 = vmatpush3.bf16.msra.mxu1 %v1223_v44  ;;  %446 = vmatprep.mubr.bf16.mxu0 %v1225_v47 }
  0x3d   :  { %1155 = vmatprep.subr.bf16.mxu1 %v1224_v48  ;;  %1157 = vmatprep.mubr.bf16.mxu1 %v1227_v49  ;;  %v1504_v49 = vld [vmem:[%s1640_s6] ss:$0 sm:$0xff] }
  0x40   :  { %1156 = vmatpush3.bf16.msra.mxu1 %v1224_v48 }
  0x43   :  { %447 = vmatmul.mubr.bf16.gmra.mrb[16].mxu0 %v1228_v50  ;;  %1158 = vmatmul.mubr.bf16.vlgmr.msra.gmra.mrb[16].mxu1 %v1229_v51 }
  0x44   :  { %454 = vmatprep.mubr.bf16.mxu0 %v1230_v52  ;;  %1161 = vmatprep.mubr.bf16.mxu1 %v1232_v53  ;;  %v1511_v52 = vld [vmem:[%s1641_s3] ss:$0 sm:$0xff] }
  0x4b   :  { %455 = vmatmul.mubr.bf16.gmra.mrb[20].mxu0 %v1233_v54  ;;  %1162 = vmatmul.mubr.bf16.gmra.mrb[20].mxu1 %v1234_v55  ;;  %v1516_v55 = vld [vmem:[%s1642_s7] ss:$0 sm:$0xff] }
  0x4c   :  { %462 = vmatprep.mubr.bf16.mxu0 %v1235_v56  ;;  %1165 = vmatprep.mubr.bf16.mxu1 %v1237_v57 }
  0x53   :  { %463 = vmatmul.mubr.bf16.gmra.mrb[24].mxu0 %v1238_v58  ;;  %1166 = vmatmul.mubr.bf16.gmra.mrb[24].mxu1 %v1239_v59 }
  0x54   :  { %470 = vmatprep.mubr.bf16.mxu0 %v1240_v60  ;;  %1169 = vmatprep.mubr.bf16.mxu1 %v1242_v61 }
  0x5b   :  { %471 = vmatmul.mubr.bf16.gmra.mrb[28].mxu0 %v1243_v62  ;;  %1170 = vmatmul.mubr.bf16.gmra.mrb[28].mxu1 %v1244_v63 }
  0xf6   :  { %v1029_v0 = vpop.f32.mrb[0].mxu0  ;;  %v1127_v1 = vpop.f32.mrb[0].mxu1 }
  0xf7   :  { %v1030_v2 = vpop.f32.mrb[1].mxu0  ;;  %v513_v3 = vpop.f32.mrb[1].mxu1 }
  0xf8   :  { %v1031_v4 = vadd.f32 %v1030_v2, %v1029_v0  ;;  %v1032_v5 = vpop.f32.mrb[2].mxu0  ;;  %v1128_v6 = vpop.f32.mrb[2].mxu1 }
  0xf9   :  { %v1033_v7 = vpop.f32.mrb[3].mxu0  ;;  %v516_v8 = vpop.f32.mrb[3].mxu1 }
  0xfa   :  { %v514_v9 = vadd.f32 %v1031_v4, %v513_v3  ;;  %v1034_v10 = vadd.f32 %v1033_v7, %v1032_v5 }
  0xfc   :  { %v517_v11 = vadd.f32 %v1034_v10, %v516_v8  ;;  %v583_v50 = vmul.f32 %v1499_v45, %v514_v9 }
  0xfe   :  { %v1035_v12 = vpop.f32.mrb[4].mxu0  ;;  %v1131_v13 = vpop.f32.mrb[4].mxu1  ;;  %v584_v60 = vmul.f32 %v1499_v45, %v517_v11 }
  0xff   :  { %v1036_v14 = vpop.f32.mrb[5].mxu0  ;;  %v529_v15 = vpop.f32.mrb[5].mxu1 }
 0x100   :  { %v1037_v16 = vadd.f32 %v1036_v14, %v1035_v12  ;;  %v1038_v17 = vpop.f32.mrb[6].mxu0  ;;  %v1132_v18 = vpop.f32.mrb[6].mxu1  ;;  %v607_v14 = vadd.f32 %v1511_v52, %v584_v60 }
 0x101   :  { %v1039_v19 = vpop.f32.mrb[7].mxu0  ;;  %v532_v20 = vpop.f32.mrb[7].mxu1 }
 0x102   :  { %v522_v21 = vadd.f32 %v1127_v1, %v1037_v16  ;;  %v1040_v22 = vadd.f32 %v1039_v19, %v1038_v17  ;;  %v606_v1 = vadd.f32 %v1511_v52, %v583_v50 }
 0x104   :  { %v525_v23 = vadd.f32 %v1128_v6, %v1040_v22  ;;  %v585_v51 = vmul.f32 %v1499_v45, %v522_v21 }
 0x106   :  { %v1041_v24 = vpop.f32.mrb[8].mxu0  ;;  %v1482_v25 = vpop.f32.mrb[8].mxu1  ;;  %v586_v56 = vmul.f32 %v1499_v45, %v525_v23  ;;  %v608_v2 = vadd.f32 %v1511_v52, %v585_v51 }
 0x107   :  { %v1042_v26 = vpop.f32.mrb[9].mxu0  ;;  %v545_v27 = vpop.f32.mrb[9].mxu1 }
 0x108   :  { %v1043_v28 = vadd.f32 %v1042_v26, %v1041_v24  ;;  %v1044_v29 = vpop.f32.mrb[10].mxu0  ;;  %v1484_v30 = vpop.f32.mrb[10].mxu1  ;;  %v609_v12 = vadd.f32 %v1511_v52, %v586_v56 }
 0x109   :  { %v1045_v31 = vpop.f32.mrb[11].mxu0  ;;  %v548_v32 = vpop.f32.mrb[11].mxu1 }
 0x10a   :  { %v530_v33 = vadd.f32 %v1043_v28, %v529_v15  ;;  %v1046_v34 = vadd.f32 %v1045_v31, %v1044_v29 }
 0x10c   :  { %v1486_v35 = vadd.f32 %v1046_v34, %v532_v20 }
 0x10e   :  { %v1047_v36 = vpop.f32.mrb[12].mxu0  ;;  %v1488_v37 = vpop.f32.mrb[12].mxu1 }
 0x10f   :  { %v1048_v38 = vpop.f32.mrb[13].mxu0  ;;  %v1490_v39 = vpop.f32.mrb[13].mxu1 }
 0x110   :  { %v1049_v40 = vadd.f32 %v1048_v38, %v1047_v36  ;;  %v1050_v41 = vpop.f32.mrb[14].mxu0  ;;  %v1492_v42 = vpop.f32.mrb[14].mxu1 }
 0x111   :  { %v1051_v43 = vpop.f32.mrb[15].mxu0  ;;  %v1494_v44 = vpop.f32.mrb[15].mxu1 }
 0x112   :  { %v538_v46 = vadd.f32 %v1131_v13, %v1049_v40  ;;  %v1052_v47 = vadd.f32 %v1051_v43, %v1050_v41 }
 0x114   :  { %v541_v48 = vadd.f32 %v1132_v18, %v1052_v47  ;;  %v587_v18 = vmul.f32 %v1499_v45, %v530_v33  ;;  %v589_v19 = vmul.f32 %v1499_v45, %v538_v46  ;;  %v588_v33 = vmul.f32 %v1499_v45, %v1486_v35 }
 0x116   :  { %v1053_v53 = vpop.f32.mrb[16].mxu0  ;;  %v1159_v54 = vpop.f32.mrb[16].mxu1  ;;  %v612_v43 = vadd.f32 %v1511_v52, %v589_v19  ;;  %v610_v35 = vadd.f32 %v1511_v52, %v587_v18 }
 0x117   :  { %v856_v57 = vmul.f32 %v1159_v54, %v1504_v49  ;;  %v1054_v58 = vpop.f32.mrb[17].mxu0  ;;  %v784_v59 = vpop.f32.mrb[17].mxu1 }
 0x118   :  { %v1055_v61 = vadd.f32 %v1054_v58, %v1053_v53  ;;  %v854_v62 = vmul.f32 %v1504_v49, %v784_v59  ;;  %v1056_v63 = vpop.f32.mrb[18].mxu0  ;;  %v1160_v0 = vpop.f32.mrb[18].mxu1 }
 0x119   :  { %v879_v3 = vadd.f32 %v1516_v55, %v856_v57  ;;  %v857_v4 = vmul.f32 %v1160_v0, %v1504_v49  ;;  %v1057_v5 = vpop.f32.mrb[19].mxu0  ;;  %v787_v6 = vpop.f32.mrb[19].mxu1 }
 0x11a   :  { %v546_v7 = vadd.f32 %v1055_v61, %v545_v27  ;;  %v877_v8 = vadd.f32 %v1516_v55, %v854_v62  ;;  %v1058_v9 = vadd.f32 %v1057_v5, %v1056_v63  ;;  %v855_v10 = vmul.f32 %v1504_v49, %v787_v6 }
 0x11b   :  { %v895_v11 = vadd.f32 %v879_v3, %v608_v2  ;;  %v880_v13 = vadd.f32 %v1516_v55, %v857_v4  ;;  %v590_v27 = vmul.f32 %v1499_v45, %v541_v48  ;;  %v611_v62 = vadd.f32 %v1511_v52, %v588_v33 }
 0x11c   :  { %v893_v15 = vadd.f32 %v877_v8, %v606_v1  ;;  %v549_v16 = vadd.f32 %v1058_v9, %v548_v32  ;;  %v878_v17 = vadd.f32 %v1516_v55, %v855_v10  ;;  %v591_v0 = vmul.f32 %v1499_v45, %v546_v7 }
 0x11d   :  { %v911_v20 = vmax.f32 %v895_v11, 0.0  ;;  %v896_v21 = vadd.f32 %v880_v13, %v609_v12  ;;  %v613_v58 = vadd.f32 %v1511_v52, %v590_v27 }
 0x11e   :  { %v909_v22 = vmax.f32 %v893_v15, 0.0  ;;  %v894_v23 = vadd.f32 %v878_v17, %v607_v14  ;;  %v1059_v24 = vpop.f32.mrb[20].mxu0  ;;  %v1163_v26 = vpop.f32.mrb[20].mxu1  ;;  %v592_v7 = vmul.f32 %v1499_v45, %v549_v16  ;;  %v614_v16 = vadd.f32 %v1511_v52, %v591_v0 }
 0x11f   :  { %927 = vst [vmem:[%s1643_s8 + $0x10] sm:$0xff] %v911_v20  ;;  %v912_v28 = vmax.f32 %v896_v21, 0.0  ;;  %v860_v29 = vmul.f32 %v1163_v26, %v1504_v49  ;;  %v1060_v31 = vpop.f32.mrb[21].mxu0  ;;  %v800_v32 = vpop.f32.mrb[21].mxu1 }
 0x120   :  { %925 = vst [vmem:[%s1643_s8] sm:$0xff] %v909_v22  ;;  %v910_v34 = vmax.f32 %v894_v23, 0.0  ;;  %v1061_v36 = vadd.f32 %v1060_v31, %v1059_v24  ;;  %v858_v38 = vmul.f32 %v1504_v49, %v800_v32  ;;  %v1062_v40 = vpop.f32.mrb[22].mxu0  ;;  %v1164_v41 = vpop.f32.mrb[22].mxu1 }
 0x121   :  { %928 = vst [vmem:[%s1643_s8 + $0x18] sm:$0xff] %v912_v28  ;;  %v883_v46 = vadd.f32 %v1516_v55, %v860_v29  ;;  %v861_v47 = vmul.f32 %v1164_v41, %v1504_v49  ;;  %v1063_v48 = vpop.f32.mrb[23].mxu0  ;;  %v803_v50 = vpop.f32.mrb[23].mxu1 }
 0x122   :  { %926 = vst [vmem:[%s1643_s8 + $0x8] sm:$0xff] %v910_v34  ;;  %v554_v51 = vadd.f32 %v1482_v25, %v1061_v36  ;;  %v881_v53 = vadd.f32 %v1516_v55, %v858_v38  ;;  %v1064_v54 = vadd.f32 %v1063_v48, %v1062_v40  ;;  %v859_v56 = vmul.f32 %v1504_v49, %v803_v50 }
 0x123   :  { %v899_v57 = vadd.f32 %v883_v46, %v612_v43  ;;  %v884_v59 = vadd.f32 %v1516_v55, %v861_v47  ;;  %v615_v34 = vadd.f32 %v1511_v52, %v592_v7 }
 0x124   :  { %v897_v60 = vadd.f32 %v881_v53, %v610_v35  ;;  %v557_v61 = vadd.f32 %v1484_v30, %v1064_v54  ;;  %v882_v63 = vadd.f32 %v1516_v55, %v859_v56  ;;  %v593_v1 = vmul.f32 %v1499_v45, %v554_v51 }
 0x125   :  { %v915_v25 = vmax.f32 %v899_v57, 0.0  ;;  %v900_v2 = vadd.f32 %v884_v59, %v613_v58 }
 0x126   :  { %v913_v3 = vmax.f32 %v897_v60, 0.0  ;;  %v898_v4 = vadd.f32 %v882_v63, %v611_v62  ;;  %v1065_v5 = vpop.f32.mrb[24].mxu0  ;;  %v1167_v6 = vpop.f32.mrb[24].mxu1  ;;  %v594_v30 = vmul.f32 %v1499_v45, %v557_v61  ;;  %v616_v18 = vadd.f32 %v1511_v52, %v593_v1 }
 0x127   :  { %931 = vst [vmem:[%s1643_s8 + $0x30] sm:$0xff] %v915_v25  ;;  %v916_v8 = vmax.f32 %v900_v2, 0.0  ;;  %v864_v9 = vmul.f32 %v1167_v6, %v1504_v49  ;;  %v1066_v10 = vpop.f32.mrb[25].mxu0  ;;  %v816_v11 = vpop.f32.mrb[25].mxu1 }
 0x128   :  { %929 = vst [vmem:[%s1643_s8 + $0x20] sm:$0xff] %v913_v3  ;;  %v914_v12 = vmax.f32 %v898_v4, 0.0  ;;  %v1067_v13 = vadd.f32 %v1066_v10, %v1065_v5  ;;  %v862_v14 = vmul.f32 %v1504_v49, %v816_v11  ;;  %v1068_v15 = vpop.f32.mrb[26].mxu0  ;;  %v1168_v17 = vpop.f32.mrb[26].mxu1  ;;  %v617_v29 = vadd.f32 %v1511_v52, %v594_v30 }
 0x129   :  { %932 = vst [vmem:[%s1643_s8 + $0x38] sm:$0xff] %v916_v8  ;;  %v887_v19 = vadd.f32 %v1516_v55, %v864_v9  ;;  %v865_v20 = vmul.f32 %v1168_v17, %v1504_v49  ;;  %v1069_v21 = vpop.f32.mrb[27].mxu0  ;;  %v819_v22 = vpop.f32.mrb[27].mxu1 }
 0x12a   :  { %930 = vst [vmem:[%s1643_s8 + $0x28] sm:$0xff] %v914_v12  ;;  %v562_v23 = vadd.f32 %v1067_v13, %v1490_v39  ;;  %v885_v24 = vadd.f32 %v1516_v55, %v862_v14  ;;  %v1070_v26 = vadd.f32 %v1069_v21, %v1068_v15  ;;  %v863_v27 = vmul.f32 %v1504_v49, %v819_v22 }
 0x12b   :  { %v903_v28 = vadd.f32 %v887_v19, %v616_v18  ;;  %v888_v31 = vadd.f32 %v1516_v55, %v865_v20 }
 0x12c   :  { %v901_v32 = vadd.f32 %v885_v24, %v614_v16  ;;  %v565_v33 = vadd.f32 %v1070_v26, %v1494_v44  ;;  %v886_v36 = vadd.f32 %v1516_v55, %v863_v27  ;;  %v595_v39 = vmul.f32 %v1499_v45, %v562_v23 }
 0x12d   :  { %v919_v38 = vmax.f32 %v903_v28, 0.0  ;;  %v904_v40 = vadd.f32 %v888_v31, %v617_v29 }
 0x12e   :  { %v917_v41 = vmax.f32 %v901_v32, 0.0  ;;  %v902_v43 = vadd.f32 %v886_v36, %v615_v34  ;;  %v1071_v46 = vpop.f32.mrb[28].mxu0  ;;  %v1171_v35 = vpop.f32.mrb[28].mxu1  ;;  %v596_v48 = vmul.f32 %v1499_v45, %v565_v33  ;;  %v618_v59 = vadd.f32 %v1511_v52, %v595_v39 }
 0x12f   :  { %935 = vst [vmem:[%s1643_s8 + $0x50] sm:$0xff] %v919_v38  ;;  %v920_v47 = vmax.f32 %v904_v40, 0.0  ;;  %v868_v44 = vmul.f32 %v1171_v35, %v1504_v49  ;;  %v1072_v50 = vpop.f32.mrb[29].mxu0  ;;  %v832_v51 = vpop.f32.mrb[29].mxu1 }
 0x130   :  { %933 = vst [vmem:[%s1643_s8 + $0x40] sm:$0xff] %v917_v41  ;;  %v918_v53 = vmax.f32 %v902_v43, 0.0  ;;  %v1073_v54 = vadd.f32 %v1072_v50, %v1071_v46  ;;  %v866_v56 = vmul.f32 %v1504_v49, %v832_v51  ;;  %v1074_v57 = vpop.f32.mrb[30].mxu0  ;;  %v1172_v58 = vpop.f32.mrb[30].mxu1  ;;  %v619_v3 = vadd.f32 %v1511_v52, %v596_v48 }
 0x131   :  { %936 = vst [vmem:[%s1643_s8 + $0x58] sm:$0xff] %v920_v47  ;;  %v1075_v60 = vpop.f32.mrb[31].mxu0  ;;  %v835_v61 = vpop.f32.mrb[31].mxu1  ;;  %v891_v1 = vadd.f32 %v1516_v55, %v868_v44  ;;  %v869_v2 = vmul.f32 %v1172_v58, %v1504_v49 }
 0x132   :  { %934 = vst [vmem:[%s1643_s8 + $0x48] sm:$0xff] %v918_v53  ;;  %v570_v62 = vadd.f32 %v1488_v37, %v1073_v54  ;;  %v889_v63 = vadd.f32 %v1516_v55, %v866_v56  ;;  %v1076_v0 = vadd.f32 %v1075_v60, %v1074_v57  ;;  %v867_v25 = vmul.f32 %v1504_v49, %v835_v61 }
 0x133   :  { %v892_v49 = vadd.f32 %v1516_v55, %v869_v2 }
 0x134   :  { %v597_v4 = vmul.f32 %v1499_v45, %v570_v62  ;;  %v905_v5 = vadd.f32 %v889_v63, %v618_v59  ;;  %v573_v6 = vadd.f32 %v1492_v42, %v1076_v0  ;;  %v890_v8 = vadd.f32 %v1516_v55, %v867_v25 }
 0x136   :  { %v620_v37 = vadd.f32 %v1511_v52, %v597_v4  ;;  %v921_v30 = vmax.f32 %v905_v5, 0.0  ;;  %v598_v9 = vmul.f32 %v1499_v45, %v573_v6  ;;  %v906_v10 = vadd.f32 %v890_v8, %v619_v3 }
 0x138   :  { %v907_v11 = vadd.f32 %v891_v1, %v620_v37  ;;  %937 = vst [vmem:[%s1643_s8 + $0x60] sm:$0xff] %v921_v30  ;;  %v621_v7 = vadd.f32 %v1511_v52, %v598_v9  ;;  %v922_v12 = vmax.f32 %v906_v10, 0.0 }
 0x13a   :  { %v923_v13 = vmax.f32 %v907_v11, 0.0  ;;  %v908_v42 = vadd.f32 %v892_v49, %v621_v7  ;;  %938 = vst [vmem:[%s1643_s8 + $0x68] sm:$0xff] %v922_v12 }
 0x13c   :  { %939 = vst [vmem:[%s1643_s8 + $0x70] sm:$0xff] %v923_v13  ;;  %v924_v45 = vmax.f32 %v908_v42, 0.0 }
 0x13e   :  { %940 = vst [vmem:[%s1643_s8 + $0x78] sm:$0xff] %v924_v45 }

// kernel: _lambda_.6
= control target key start
LH: loop header
LB: loop body
LE: loop exit
PB: predicated region body
PF: predicated region fallthrough
CT: control target
= control target key end

     0   :  { %s1248_s1 = inlined_call_operand.vmem [shape: bf16[384,128], index: 1, kind: input, shape index: {}]   ;;  %s1249_s0 = inlined_call_operand.vmem [shape: bf16[128,384], index: 0, kind: input, shape index: {}]   ;;  %s1250_s2 = inlined_call_operand.vmem [shape: f32[1,128], index: 2, kind: input, shape index: {}]   ;;  %s1251_s3 = inlined_call_operand.vmem [shape: f32[1,128], index: 3, kind: input, shape index: {}]   ;;  %s1252_s4 = inlined_call_operand.vmem [shape: bf16[128,128], index: 4, kind: output, shape index: {}]  }
   0x1   :  { %v951_v0 = vld [vmem:[%s1248_s1 + $0x40] sm:$0xff]   ;;  %v954_v3 = vld [vmem:[%s1248_s1 + $0x48] sm:$0xff]   ;;  %v957_v6 = vld [vmem:[%s1248_s1 + $0x50] sm:$0xff]  }
   0x2   :  { %v952_v1 = vld [vmem:[%s1248_s1] sm:$0xff]   ;;  %839 = vmatprep.subr.bf16.mxu0 %v951_v0  ;;  %v955_v4 = vld [vmem:[%s1248_s1 + $0x8] sm:$0xff]   ;;  %v958_v7 = vld [vmem:[%s1248_s1 + $0x10] sm:$0xff]  }
   0x3   :  { %v953_v2 = vld [vmem:[%s1248_s1 + $0x80] sm:$0xff]   ;;  %840 = vmatpush3.bf16.msra.mxu0 %v952_v1  ;;  %v956_v5 = vld [vmem:[%s1248_s1 + $0x88] sm:$0xff]   ;;  %v959_v8 = vld [vmem:[%s1248_s1 + $0x90] sm:$0xff]  }
   0x4   :  { %919 = vmatprep.subr.bf16.mxu1 %v953_v2  ;;  %841 = vmatprep.subr.bf16.mxu0 %v954_v3  ;;  %v960_v9 = vld [vmem:[%s1248_s1 + $0x58] sm:$0xff]   ;;  %v963_v12 = vld [vmem:[%s1248_s1 + $0x60] sm:$0xff]   ;;  %v966_v15 = vld [vmem:[%s1248_s1 + $0x68] sm:$0xff]  }
   0x5   :  { %920 = vmatpush3.bf16.msra.mxu1 %v953_v2  ;;  %v961_v10 = vld [vmem:[%s1248_s1 + $0x18] sm:$0xff]   ;;  %v965_v13 = vld [vmem:[%s1248_s1 + $0xa0] sm:$0xff]   ;;  %v968_v16 = vld [vmem:[%s1248_s1 + $0xa8] sm:$0xff]  }
   0x6   :  { %921 = vmatprep.subr.bf16.mxu1 %v956_v5  ;;  %v962_v11 = vld [vmem:[%s1248_s1 + $0x98] sm:$0xff]   ;;  %v964_v14 = vld [vmem:[%s1248_s1 + $0x20] sm:$0xff]   ;;  %v967_v17 = vld [vmem:[%s1248_s1 + $0x28] sm:$0xff]  }
   0x7   :  { %842 = vmatpush3.bf16.msra.mxu0 %v955_v4  ;;  %v969_v18 = vld [vmem:[%s1248_s1 + $0x70] sm:$0xff]   ;;  %v972_v21 = vld [vmem:[%s1248_s1 + $0x78] sm:$0xff]   ;;  %v975_v26 = vld [vmem:[%s1249_s0] ss:$12 sps:$4 sm:$0xff]  }
   0x8   :  { %843 = vmatprep.subr.bf16.mxu0 %v957_v6  ;;  %v970_v19 = vld [vmem:[%s1248_s1 + $0x30] sm:$0xff]   ;;  %v974_v22 = vld [vmem:[%s1248_s1 + $0xb8] sm:$0xff]   ;;  %v979_v28 = vld [vmem:[%s1249_s0 + $0x20] ss:$12 sps:$4 sm:$0xff]  }
   0x9   :  { %922 = vmatpush3.bf16.msra.mxu1 %v956_v5  ;;  %v971_v20 = vld [vmem:[%s1248_s1 + $0xb0] sm:$0xff]   ;;  %v973_v25 = vld [vmem:[%s1248_s1 + $0x38] sm:$0xff]   ;;  %v995_v36 = vld [vmem:[%s1249_s0 + $0x80] ss:$12 sps:$4 sm:$0xff]  }
   0xa   :  { %923 = vmatprep.subr.bf16.mxu1 %v959_v8  ;;  %v977_v23 = vld [vmem:[%s1249_s0 + $0x4] ss:$12 sps:$4 sm:$0xff]   ;;  %v978_v24 = vld [vmem:[%s1249_s0 + $0x8] ss:$12 sps:$4 sm:$0xff]   ;;  %v988_v35 = vld [vmem:[%s1249_s0 + $0x4c] ss:$12 sps:$4 sm:$0xff]  }
   0xb   :  { %844 = vmatpush3.bf16.msra.mxu0 %v958_v7  ;;  %402 = vmatprep.mubr.bf16.mxu0 %v977_v23  ;;  %v980_v27 = vld [vmem:[%s1249_s0 + $0x1c] ss:$12 sps:$4 sm:$0xff]   ;;  %v986_v29 = vld [vmem:[%s1249_s0 + $0x38] ss:$12 sps:$4 sm:$0xff]   ;;  %v983_v31 = vld [vmem:[%s1249_s0 + $0x34] ss:$12 sps:$4 sm:$0xff]  }
   0xc   :  { %845 = vmatprep.subr.bf16.mxu0 %v960_v9  ;;  %935 = vmatprep.mubr.bf16.mxu1 %v978_v24  ;;  %v982_v30 = vld [vmem:[%s1249_s0 + $0x18] ss:$12 sps:$4 sm:$0xff]   ;;  %v987_v32 = vld [vmem:[%s1249_s0 + $0x50] ss:$12 sps:$4 sm:$0xff]   ;;  %v994_v33 = vld [vmem:[%s1249_s0 + $0x68] ss:$12 sps:$4 sm:$0xff]  }
   0xd   :  { %924 = vmatpush3.bf16.msra.mxu1 %v959_v8  ;;  %v985_v34 = vld [vmem:[%s1249_s0 + $0x30] ss:$12 sps:$4 sm:$0xff]   ;;  %v1002_v37 = vld [vmem:[%s1249_s0 + $0x98] ss:$12 sps:$4 sm:$0xff]   ;;  %v990_v38 = vld [vmem:[%s1249_s0 + $0x48] ss:$12 sps:$4 sm:$0xff]  }
   0xe   :  { %925 = vmatprep.subr.bf16.mxu1 %v962_v11  ;;  %v991_v39 = vld [vmem:[%s1249_s0 + $0x64] ss:$12 sps:$4 sm:$0xff]   ;;  %v993_v41 = vld [vmem:[%s1249_s0 + $0x60] ss:$12 sps:$4 sm:$0xff]   ;;  %v996_v42 = vld [vmem:[%s1249_s0 + $0x7c] ss:$12 sps:$4 sm:$0xff]  }
   0xf   :  { %846 = vmatpush3.bf16.msra.mxu0 %v961_v10  ;;  %v1003_v40 = vld [vmem:[%s1249_s0 + $0xb0] ss:$12 sps:$4 sm:$0xff]   ;;  %v998_v43 = vld [vmem:[%s1249_s0 + $0x78] ss:$12 sps:$4 sm:$0xff]   ;;  %v999_v44 = vld [vmem:[%s1249_s0 + $0x94] ss:$12 sps:$4 sm:$0xff]  }
  0x10   :  { %847 = vmatprep.subr.bf16.mxu0 %v963_v12  ;;  %v1001_v45 = vld [vmem:[%s1249_s0 + $0x90] ss:$12 sps:$4 sm:$0xff]   ;;  %v1004_v46 = vld [vmem:[%s1249_s0 + $0xac] ss:$12 sps:$4 sm:$0xff]   ;;  %v1006_v47 = vld [vmem:[%s1249_s0 + $0xa8] ss:$12 sps:$4 sm:$0xff]  }
  0x11   :  { %926 = vmatpush3.bf16.msra.mxu1 %v962_v11  ;;  %v1179_v55 = vld [vmem:[%s1250_s2] ss:$0 sm:$0xff] }
  0x12   :  { %927 = vmatprep.subr.bf16.mxu1 %v965_v13  ;;  %v1184_v59 = vld [vmem:[%s1251_s3] ss:$0 sm:$0xff] }
  0x13   :  { %848 = vmatpush3.bf16.msra.mxu0 %v964_v14 }
  0x14   :  { %849 = vmatprep.subr.bf16.mxu0 %v966_v15 }
  0x15   :  { %928 = vmatpush3.bf16.msra.mxu1 %v965_v13 }
  0x16   :  { %929 = vmatprep.subr.bf16.mxu1 %v968_v16 }
  0x17   :  { %850 = vmatpush3.bf16.msra.mxu0 %v967_v17 }
  0x18   :  { %851 = vmatprep.subr.bf16.mxu0 %v969_v18 }
  0x19   :  { %930 = vmatpush3.bf16.msra.mxu1 %v968_v16 }
  0x1a   :  { %931 = vmatprep.subr.bf16.mxu1 %v971_v20 }
  0x1b   :  { %852 = vmatpush3.bf16.msra.mxu0 %v970_v19 }
  0x1c   :  { %853 = vmatprep.subr.bf16.mxu0 %v972_v21 }
  0x1d   :  { %932 = vmatpush3.bf16.msra.mxu1 %v971_v20 }
  0x1e   :  { %933 = vmatprep.subr.bf16.mxu1 %v974_v22 }
  0x1f   :  { %854 = vmatpush3.bf16.msra.mxu0 %v973_v25 }
  0x21   :  { %934 = vmatpush3.bf16.msra.mxu1 %v974_v22 }
  0x22   :  { %403 = vmatmul.mubr.bf16.vlgmr.msra.gmra.mrb[0].mxu0 %v975_v26 }
  0x23   :  { %410 = vmatprep.mubr.bf16.mxu0 %v980_v27 }
  0x24   :  { %936 = vmatmul.mubr.bf16.vlgmr.msra.gmra.mrb[0].mxu1 %v979_v28 }
  0x25   :  { %939 = vmatprep.mubr.bf16.mxu1 %v986_v29 }
  0x2a   :  { %411 = vmatmul.mubr.bf16.gmra.mrb[4].mxu0 %v982_v30 }
  0x2b   :  { %418 = vmatprep.mubr.bf16.mxu0 %v983_v31 }
  0x2c   :  { %940 = vmatmul.mubr.bf16.gmra.mrb[4].mxu1 %v987_v32 }
  0x2d   :  { %943 = vmatprep.mubr.bf16.mxu1 %v994_v33 }
  0x32   :  { %419 = vmatmul.mubr.bf16.gmra.mrb[8].mxu0 %v985_v34 }
  0x33   :  { %426 = vmatprep.mubr.bf16.mxu0 %v988_v35 }
  0x34   :  { %944 = vmatmul.mubr.bf16.gmra.mrb[8].mxu1 %v995_v36 }
  0x35   :  { %947 = vmatprep.mubr.bf16.mxu1 %v1002_v37 }
  0x3a   :  { %427 = vmatmul.mubr.bf16.gmra.mrb[12].mxu0 %v990_v38 }
  0x3b   :  { %434 = vmatprep.mubr.bf16.mxu0 %v991_v39 }
  0x3c   :  { %948 = vmatmul.mubr.bf16.gmra.mrb[12].mxu1 %v1003_v40 }
  0x42   :  { %435 = vmatmul.mubr.bf16.gmra.mrb[16].mxu0 %v993_v41 }
  0x43   :  { %442 = vmatprep.mubr.bf16.mxu0 %v996_v42 }
  0x4a   :  { %443 = vmatmul.mubr.bf16.gmra.mrb[20].mxu0 %v998_v43 }
  0x4b   :  { %450 = vmatprep.mubr.bf16.mxu0 %v999_v44 }
  0x52   :  { %451 = vmatmul.mubr.bf16.gmra.mrb[24].mxu0 %v1001_v45 }
  0x53   :  { %458 = vmatprep.mubr.bf16.mxu0 %v1004_v46 }
  0x5a   :  { %459 = vmatmul.mubr.bf16.gmra.mrb[28].mxu0 %v1006_v47 }
  0xf5   :  { %v855_v48 = vpop.f32.mrb[0].mxu0 }
  0xf6   :  { %v856_v49 = vpop.f32.mrb[1].mxu0 }
  0xf7   :  { %v857_v50 = vadd.f32 %v856_v49, %v855_v48  ;;  %v858_v51 = vpop.f32.mrb[2].mxu0  ;;  %v937_v52 = vpop.f32.mrb[0].mxu1 }
  0xf8   :  { %v859_v53 = vpop.f32.mrb[3].mxu0  ;;  %v501_v54 = vpop.f32.mrb[1].mxu1 }
  0xf9   :  { %v860_v56 = vadd.f32 %v859_v53, %v858_v51  ;;  %v502_v57 = vadd.f32 %v857_v50, %v501_v54  ;;  %v938_v58 = vpop.f32.mrb[2].mxu1 }
  0xfa   :  { %v504_v60 = vpop.f32.mrb[3].mxu1 }
  0xfb   :  { %v571_v61 = vmul.f32 %v1179_v55, %v502_v57  ;;  %v505_v62 = vadd.f32 %v860_v56, %v504_v60 }
  0xfd   :  { %v594_v63 = vadd.f32 %v1184_v59, %v571_v61  ;;  %v572_v0 = vmul.f32 %v1179_v55, %v505_v62  ;;  %v861_v1 = vpop.f32.mrb[4].mxu0 }
  0xfe   :  { %v862_v2 = vpop.f32.mrb[5].mxu0 }
  0xff   :  { %v595_v3 = vadd.f32 %v1184_v59, %v572_v0  ;;  %v863_v4 = vadd.f32 %v862_v2, %v861_v1  ;;  %v864_v5 = vpop.f32.mrb[6].mxu0  ;;  %v941_v6 = vpop.f32.mrb[4].mxu1  ;;  %v610_v9 = vmax.f32 %v594_v63, 0.0 }
 0x100   :  { %v865_v7 = vpop.f32.mrb[7].mxu0  ;;  %v517_v8 = vpop.f32.mrb[5].mxu1 }
 0x101   :  { %v611_v10 = vmax.f32 %v595_v3, 0.0  ;;  %v510_v11 = vadd.f32 %v937_v52, %v863_v4  ;;  %v866_v12 = vadd.f32 %v865_v7, %v864_v5  ;;  %v942_v13 = vpop.f32.mrb[6].mxu1 }
 0x102   :  { %v520_v14 = vpop.f32.mrb[7].mxu1 }
 0x103   :  { %v795_v15 = vpack.c.bf16 %v611_v10, %v610_v9  ;;  %v573_v16 = vmul.f32 %v1179_v55, %v510_v11  ;;  %v513_v17 = vadd.f32 %v938_v58, %v866_v12 }
 0x105   :  { %796 = vst [vmem:[%s1252_s4] sm:$0xff] %v795_v15   ;;  %v596_v18 = vadd.f32 %v1184_v59, %v573_v16  ;;  %v574_v19 = vmul.f32 %v1179_v55, %v513_v17  ;;  %v867_v20 = vpop.f32.mrb[8].mxu0 }
 0x106   :  { %v868_v21 = vpop.f32.mrb[9].mxu0 }
 0x107   :  { %v597_v22 = vadd.f32 %v1184_v59, %v574_v19  ;;  %v869_v23 = vadd.f32 %v868_v21, %v867_v20  ;;  %v870_v24 = vpop.f32.mrb[10].mxu0  ;;  %v945_v25 = vpop.f32.mrb[8].mxu1  ;;  %v612_v28 = vmax.f32 %v596_v18, 0.0 }
 0x108   :  { %v871_v26 = vpop.f32.mrb[11].mxu0  ;;  %v533_v27 = vpop.f32.mrb[9].mxu1 }
 0x109   :  { %v613_v29 = vmax.f32 %v597_v22, 0.0  ;;  %v872_v30 = vadd.f32 %v871_v26, %v870_v24  ;;  %v518_v31 = vadd.f32 %v869_v23, %v517_v8  ;;  %v946_v32 = vpop.f32.mrb[10].mxu1 }
 0x10a   :  { %v536_v33 = vpop.f32.mrb[11].mxu1 }
 0x10b   :  { %v800_v34 = vpack.c.bf16 %v613_v29, %v612_v28  ;;  %v575_v35 = vmul.f32 %v1179_v55, %v518_v31  ;;  %v521_v36 = vadd.f32 %v872_v30, %v520_v14 }
 0x10d   :  { %832 = vst [vmem:[%s1252_s4 + $0x8] sm:$0xff] %v800_v34   ;;  %v598_v37 = vadd.f32 %v1184_v59, %v575_v35  ;;  %v576_v38 = vmul.f32 %v1179_v55, %v521_v36  ;;  %v873_v39 = vpop.f32.mrb[12].mxu0 }
 0x10e   :  { %v874_v40 = vpop.f32.mrb[13].mxu0 }
 0x10f   :  { %v599_v41 = vadd.f32 %v1184_v59, %v576_v38  ;;  %v875_v42 = vadd.f32 %v874_v40, %v873_v39  ;;  %v876_v43 = vpop.f32.mrb[14].mxu0  ;;  %v1204_v44 = vpop.f32.mrb[12].mxu1  ;;  %v614_v47 = vmax.f32 %v598_v37, 0.0 }
 0x110   :  { %v877_v45 = vpop.f32.mrb[15].mxu0  ;;  %v549_v46 = vpop.f32.mrb[13].mxu1 }
 0x111   :  { %v615_v48 = vmax.f32 %v599_v41, 0.0  ;;  %v526_v49 = vadd.f32 %v941_v6, %v875_v42  ;;  %v878_v50 = vadd.f32 %v877_v45, %v876_v43  ;;  %v1206_v51 = vpop.f32.mrb[14].mxu1 }
 0x112   :  { %v552_v52 = vpop.f32.mrb[15].mxu1 }
 0x113   :  { %v805_v53 = vpack.c.bf16 %v615_v48, %v614_v47  ;;  %v577_v54 = vmul.f32 %v1179_v55, %v526_v49  ;;  %v529_v56 = vadd.f32 %v942_v13, %v878_v50 }
 0x115   :  { %833 = vst [vmem:[%s1252_s4 + $0x10] sm:$0xff] %v805_v53   ;;  %v600_v57 = vadd.f32 %v1184_v59, %v577_v54  ;;  %v578_v58 = vmul.f32 %v1179_v55, %v529_v56  ;;  %v879_v60 = vpop.f32.mrb[16].mxu0 }
 0x116   :  { %v880_v61 = vpop.f32.mrb[17].mxu0 }
 0x117   :  { %v601_v62 = vadd.f32 %v1184_v59, %v578_v58  ;;  %v881_v63 = vadd.f32 %v880_v61, %v879_v60  ;;  %v882_v0 = vpop.f32.mrb[18].mxu0  ;;  %v616_v2 = vmax.f32 %v600_v57, 0.0 }
 0x118   :  { %v883_v1 = vpop.f32.mrb[19].mxu0 }
 0x119   :  { %v617_v3 = vmax.f32 %v601_v62, 0.0  ;;  %v884_v4 = vadd.f32 %v883_v1, %v882_v0  ;;  %v534_v5 = vadd.f32 %v881_v63, %v533_v27 }
 0x11b   :  { %v810_v6 = vpack.c.bf16 %v617_v3, %v616_v2  ;;  %v579_v7 = vmul.f32 %v1179_v55, %v534_v5  ;;  %v537_v8 = vadd.f32 %v884_v4, %v536_v33 }
 0x11d   :  { %834 = vst [vmem:[%s1252_s4 + $0x18] sm:$0xff] %v810_v6   ;;  %v602_v9 = vadd.f32 %v1184_v59, %v579_v7  ;;  %v580_v10 = vmul.f32 %v1179_v55, %v537_v8  ;;  %v885_v11 = vpop.f32.mrb[20].mxu0 }
 0x11e   :  { %v886_v12 = vpop.f32.mrb[21].mxu0 }
 0x11f   :  { %v603_v13 = vadd.f32 %v1184_v59, %v580_v10  ;;  %v887_v14 = vadd.f32 %v886_v12, %v885_v11  ;;  %v888_v15 = vpop.f32.mrb[22].mxu0  ;;  %v618_v17 = vmax.f32 %v602_v9, 0.0 }
 0x120   :  { %v889_v16 = vpop.f32.mrb[23].mxu0 }
 0x121   :  { %v619_v18 = vmax.f32 %v603_v13, 0.0  ;;  %v542_v19 = vadd.f32 %v945_v25, %v887_v14  ;;  %v890_v20 = vadd.f32 %v889_v16, %v888_v15 }
 0x123   :  { %v815_v21 = vpack.c.bf16 %v619_v18, %v618_v17  ;;  %v581_v22 = vmul.f32 %v1179_v55, %v542_v19  ;;  %v545_v23 = vadd.f32 %v946_v32, %v890_v20 }
 0x125   :  { %835 = vst [vmem:[%s1252_s4 + $0x20] sm:$0xff] %v815_v21   ;;  %v604_v24 = vadd.f32 %v1184_v59, %v581_v22  ;;  %v582_v26 = vmul.f32 %v1179_v55, %v545_v23  ;;  %v891_v27 = vpop.f32.mrb[24].mxu0 }
 0x126   :  { %v892_v28 = vpop.f32.mrb[25].mxu0 }
 0x127   :  { %v605_v29 = vadd.f32 %v1184_v59, %v582_v26  ;;  %v893_v30 = vadd.f32 %v892_v28, %v891_v27  ;;  %v894_v31 = vpop.f32.mrb[26].mxu0  ;;  %v620_v33 = vmax.f32 %v604_v24, 0.0 }
 0x128   :  { %v895_v25 = vpop.f32.mrb[27].mxu0 }
 0x129   :  { %v621_v34 = vmax.f32 %v605_v29, 0.0  ;;  %v896_v35 = vadd.f32 %v895_v25, %v894_v31  ;;  %v550_v36 = vadd.f32 %v893_v30, %v549_v46 }
 0x12b   :  { %v820_v32 = vpack.c.bf16 %v621_v34, %v620_v33  ;;  %v583_v37 = vmul.f32 %v1179_v55, %v550_v36  ;;  %v553_v38 = vadd.f32 %v896_v35, %v552_v52 }
 0x12d   :  { %836 = vst [vmem:[%s1252_s4 + $0x28] sm:$0xff] %v820_v32   ;;  %v606_v39 = vadd.f32 %v1184_v59, %v583_v37  ;;  %v584_v40 = vmul.f32 %v1179_v55, %v553_v38  ;;  %v897_v41 = vpop.f32.mrb[28].mxu0 }
 0x12e   :  { %v898_v42 = vpop.f32.mrb[29].mxu0 }
 0x12f   :  { %v607_v43 = vadd.f32 %v1184_v59, %v584_v40  ;;  %v899_v45 = vadd.f32 %v898_v42, %v897_v41  ;;  %v900_v47 = vpop.f32.mrb[30].mxu0  ;;  %v622_v46 = vmax.f32 %v606_v39, 0.0 }
 0x130   :  { %v901_v48 = vpop.f32.mrb[31].mxu0 }
 0x131   :  { %v623_v49 = vmax.f32 %v607_v43, 0.0  ;;  %v558_v50 = vadd.f32 %v1204_v44, %v899_v45  ;;  %v902_v52 = vadd.f32 %v901_v48, %v900_v47 }
 0x133   :  { %v825_v53 = vpack.c.bf16 %v623_v49, %v622_v46  ;;  %v585_v54 = vmul.f32 %v1179_v55, %v558_v50  ;;  %v561_v56 = vadd.f32 %v1206_v51, %v902_v52 }
 0x135   :  { %837 = vst [vmem:[%s1252_s4 + $0x30] sm:$0xff] %v825_v53   ;;  %v608_v57 = vadd.f32 %v1184_v59, %v585_v54  ;;  %v586_v58 = vmul.f32 %v1179_v55, %v561_v56 }
 0x137   :  { %v609_v60 = vadd.f32 %v1184_v59, %v586_v58  ;;  %v624_v61 = vmax.f32 %v608_v57, 0.0 }
 0x139   :  { %v625_v62 = vmax.f32 %v609_v60, 0.0 }
 0x13b   :  { %v830_v63 = vpack.c.bf16 %v625_v62, %v624_v61 }
 0x13d   :  { %838 = vst [vmem:[%s1252_s4 + $0x38] sm:$0xff] %v830_v63  }

// kernel: _lambda_.7
= control target key start
LH: loop header
LB: loop body
LE: loop exit
PB: predicated region body
PF: predicated region fallthrough
CT: control target
= control target key end

     0   :  { %s1236_s0 = inlined_call_operand.vmem [shape: bf16[128,384], index: 0, kind: input, shape index: {}]   ;;  %s1237_s1 = inlined_call_operand.vmem [shape: bf16[384,128], index: 1, kind: input, shape index: {}]   ;;  %s1238_s2 = inlined_call_operand.vmem [shape: f32[1,128], index: 2, kind: input, shape index: {}]   ;;  %s1239_s3 = inlined_call_operand.vmem [shape: f32[1,128], index: 3, kind: input, shape index: {}]   ;;  %s1240_s4 = inlined_call_operand.vmem [shape: f32[128,128], index: 4, kind: input, shape index: {}]   ;;  %s1241_s5 = inlined_call_operand.hbm [shape: f32[128,128], index: 5, kind: output, shape index: {}]  }
   0x1   :  { %v859_v0 = vld [vmem:[%s1237_s1 + $0x40] sm:$0xff]   ;;  %v862_v3 = vld [vmem:[%s1237_s1 + $0x48] sm:$0xff]   ;;  %v865_v6 = vld [vmem:[%s1237_s1 + $0x50] sm:$0xff]  }
   0x2   :  { %v860_v1 = vld [vmem:[%s1237_s1] sm:$0xff]   ;;  %744 = vmatprep.subr.bf16.mxu0 %v859_v0  ;;  %v863_v4 = vld [vmem:[%s1237_s1 + $0x8] sm:$0xff]   ;;  %v866_v7 = vld [vmem:[%s1237_s1 + $0x10] sm:$0xff]  }
   0x3   :  { %v861_v2 = vld [vmem:[%s1237_s1 + $0x80] sm:$0xff]   ;;  %745 = vmatpush3.bf16.msra.mxu0 %v860_v1  ;;  %v864_v5 = vld [vmem:[%s1237_s1 + $0x88] sm:$0xff]   ;;  %v867_v8 = vld [vmem:[%s1237_s1 + $0x90] sm:$0xff]  }
   0x4   :  { %824 = vmatprep.subr.bf16.mxu1 %v861_v2  ;;  %746 = vmatprep.subr.bf16.mxu0 %v862_v3  ;;  %v868_v9 = vld [vmem:[%s1237_s1 + $0x58] sm:$0xff]   ;;  %v871_v12 = vld [vmem:[%s1237_s1 + $0x60] sm:$0xff]   ;;  %v874_v15 = vld [vmem:[%s1237_s1 + $0x68] sm:$0xff]  }
   0x5   :  { %825 = vmatpush3.bf16.msra.mxu1 %v861_v2  ;;  %v869_v10 = vld [vmem:[%s1237_s1 + $0x18] sm:$0xff]   ;;  %v873_v13 = vld [vmem:[%s1237_s1 + $0xa0] sm:$0xff]   ;;  %v876_v16 = vld [vmem:[%s1237_s1 + $0xa8] sm:$0xff]  }
   0x6   :  { %826 = vmatprep.subr.bf16.mxu1 %v864_v5  ;;  %v870_v11 = vld [vmem:[%s1237_s1 + $0x98] sm:$0xff]   ;;  %v872_v14 = vld [vmem:[%s1237_s1 + $0x20] sm:$0xff]   ;;  %v875_v17 = vld [vmem:[%s1237_s1 + $0x28] sm:$0xff]  }
   0x7   :  { %747 = vmatpush3.bf16.msra.mxu0 %v863_v4  ;;  %v877_v18 = vld [vmem:[%s1237_s1 + $0x70] sm:$0xff]   ;;  %v880_v21 = vld [vmem:[%s1237_s1 + $0x78] sm:$0xff]   ;;  %v883_v26 = vld [vmem:[%s1236_s0] ss:$12 sps:$4 sm:$0xff]  }
   0x8   :  { %748 = vmatprep.subr.bf16.mxu0 %v865_v6  ;;  %v878_v19 = vld [vmem:[%s1237_s1 + $0x30] sm:$0xff]   ;;  %v882_v22 = vld [vmem:[%s1237_s1 + $0xb8] sm:$0xff]   ;;  %v887_v28 = vld [vmem:[%s1236_s0 + $0x20] ss:$12 sps:$4 sm:$0xff]  }
   0x9   :  { %827 = vmatpush3.bf16.msra.mxu1 %v864_v5  ;;  %v879_v20 = vld [vmem:[%s1237_s1 + $0xb0] sm:$0xff]   ;;  %v881_v25 = vld [vmem:[%s1237_s1 + $0x38] sm:$0xff]  }
   0xa   :  { %828 = vmatprep.subr.bf16.mxu1 %v867_v8  ;;  %v885_v23 = vld [vmem:[%s1236_s0 + $0x4] ss:$12 sps:$4 sm:$0xff]   ;;  %v886_v24 = vld [vmem:[%s1236_s0 + $0x8] ss:$12 sps:$4 sm:$0xff]  }
   0xb   :  { %749 = vmatpush3.bf16.msra.mxu0 %v866_v7  ;;  %406 = vmatprep.mubr.bf16.mxu0 %v885_v23  ;;  %v888_v27 = vld [vmem:[%s1236_s0 + $0x1c] ss:$12 sps:$4 sm:$0xff]   ;;  %v894_v29 = vld [vmem:[%s1236_s0 + $0x38] ss:$12 sps:$4 sm:$0xff]   ;;  %v891_v31 = vld [vmem:[%s1236_s0 + $0x34] ss:$12 sps:$4 sm:$0xff]  }
   0xc   :  { %750 = vmatprep.subr.bf16.mxu0 %v868_v9  ;;  %840 = vmatprep.mubr.bf16.mxu1 %v886_v24  ;;  %v890_v30 = vld [vmem:[%s1236_s0 + $0x18] ss:$12 sps:$4 sm:$0xff]   ;;  %v895_v32 = vld [vmem:[%s1236_s0 + $0x50] ss:$12 sps:$4 sm:$0xff]   ;;  %v902_v33 = vld [vmem:[%s1236_s0 + $0x68] ss:$12 sps:$4 sm:$0xff]  }
   0xd   :  { %829 = vmatpush3.bf16.msra.mxu1 %v867_v8 }
   0xe   :  { %830 = vmatprep.subr.bf16.mxu1 %v870_v11 }
   0xf   :  { %751 = vmatpush3.bf16.msra.mxu0 %v869_v10 }
  0x10   :  { %752 = vmatprep.subr.bf16.mxu0 %v871_v12 }
  0x11   :  { %831 = vmatpush3.bf16.msra.mxu1 %v870_v11 }
  0x12   :  { %832 = vmatprep.subr.bf16.mxu1 %v873_v13 }
  0x13   :  { %753 = vmatpush3.bf16.msra.mxu0 %v872_v14 }
  0x14   :  { %754 = vmatprep.subr.bf16.mxu0 %v874_v15 }
  0x15   :  { %833 = vmatpush3.bf16.msra.mxu1 %v873_v13 }
  0x16   :  { %834 = vmatprep.subr.bf16.mxu1 %v876_v16 }
  0x17   :  { %755 = vmatpush3.bf16.msra.mxu0 %v875_v17 }
  0x18   :  { %756 = vmatprep.subr.bf16.mxu0 %v877_v18 }
  0x19   :  { %835 = vmatpush3.bf16.msra.mxu1 %v876_v16 }
  0x1a   :  { %836 = vmatprep.subr.bf16.mxu1 %v879_v20 }
  0x1b   :  { %757 = vmatpush3.bf16.msra.mxu0 %v878_v19 }
  0x1c   :  { %758 = vmatprep.subr.bf16.mxu0 %v880_v21 }
  0x1d   :  { %837 = vmatpush3.bf16.msra.mxu1 %v879_v20 }
  0x1e   :  { %838 = vmatprep.subr.bf16.mxu1 %v882_v22 }
  0x1f   :  { %759 = vmatpush3.bf16.msra.mxu0 %v881_v25 }
  0x21   :  { %839 = vmatpush3.bf16.msra.mxu1 %v882_v22 }
  0x22   :  { %407 = vmatmul.mubr.bf16.vlgmr.msra.gmra.mrb[0].mxu0 %v883_v26 }
  0x23   :  { %414 = vmatprep.mubr.bf16.mxu0 %v888_v27 }
  0x24   :  { %841 = vmatmul.mubr.bf16.vlgmr.msra.gmra.mrb[0].mxu1 %v887_v28 }
  0x25   :  { %844 = vmatprep.mubr.bf16.mxu1 %v894_v29 }
  0x2a   :  { %415 = vmatmul.mubr.bf16.gmra.mrb[4].mxu0 %v890_v30 }
  0x2b   :  { %10 = vsyncpa [#allocation3], 0  ;;  %422 = vmatprep.mubr.bf16.mxu0 %v891_v31  ;;  %v893_v34 = vld [vmem:[%s1236_s0 + $0x30] ss:$12 sps:$4 sm:$0xff]   ;;  %v896_v35 = vld [vmem:[%s1236_s0 + $0x4c] ss:$12 sps:$4 sm:$0xff]  }
  0x2c   :  { %845 = vmatmul.mubr.bf16.gmra.mrb[4].mxu1 %v895_v32  ;;  %v903_v36 = vld [vmem:[%s1236_s0 + $0x80] ss:$12 sps:$4 sm:$0xff]   ;;  %v910_v37 = vld [vmem:[%s1236_s0 + $0x98] ss:$12 sps:$4 sm:$0xff]   ;;  %v898_v38 = vld [vmem:[%s1236_s0 + $0x48] ss:$12 sps:$4 sm:$0xff]  }
  0x2d   :  { %848 = vmatprep.mubr.bf16.mxu1 %v902_v33  ;;  %v899_v39 = vld [vmem:[%s1236_s0 + $0x64] ss:$12 sps:$4 sm:$0xff]   ;;  %v901_v41 = vld [vmem:[%s1236_s0 + $0x60] ss:$12 sps:$4 sm:$0xff]   ;;  %v904_v42 = vld [vmem:[%s1236_s0 + $0x7c] ss:$12 sps:$4 sm:$0xff]  }
  0x2e   :  { %v911_v40 = vld [vmem:[%s1236_s0 + $0xb0] ss:$12 sps:$4 sm:$0xff]   ;;  %v906_v43 = vld [vmem:[%s1236_s0 + $0x78] ss:$12 sps:$4 sm:$0xff]   ;;  %v907_v44 = vld [vmem:[%s1236_s0 + $0x94] ss:$12 sps:$4 sm:$0xff]  }
  0x2f   :  { %v909_v45 = vld [vmem:[%s1236_s0 + $0x90] ss:$12 sps:$4 sm:$0xff]   ;;  %v912_v46 = vld [vmem:[%s1236_s0 + $0xac] ss:$12 sps:$4 sm:$0xff]   ;;  %v914_v47 = vld [vmem:[%s1236_s0 + $0xa8] ss:$12 sps:$4 sm:$0xff]  }
  0x30   :  { %v1119_v55 = vld [vmem:[%s1238_s2] ss:$0 sm:$0xff]  ;;  %v615_v3 = vld [vmem:[%s1240_s4 + $0x8] sm:$0xff]  ;;  %v616_v21 = vld [vmem:[%s1240_s4 + $0x10] sm:$0xff]  ;;  %s939_s17 = smov [#allocation2]  }
  0x31   :  { %v1124_v59 = vld [vmem:[%s1239_s3] ss:$0 sm:$0xff]  ;;  %v617_v25 = vld [vmem:[%s1240_s4 + $0x18] sm:$0xff]  ;;  %s683_s3 = sshll.u32 %s939_s17, 4  ;;  %s684_s3 = int_to_ptr.vmem [resolvable:$true] %s683_s3 }
  0x32   :  { %423 = vmatmul.mubr.bf16.gmra.mrb[8].mxu0 %v893_v34  ;;  %v614_v63 = vld [vmem:[%s1240_s4] sm:$0xff]  ;;  %s915_s18 = scalar_lea.vmem %s684_s3, 2048  ;;  %p920_p1 = scmp.lt.s32.totalorder %s684_s3, %s684_s3 }
  0x33   :  { %430 = vmatprep.mubr.bf16.mxu0 %v896_v35  ;;  %p916_p0 = scmp.ne.s32.totalorder %s684_s3, %s915_s18  ;;  %p921_p2 = scmp.lt.s32.totalorder %s915_s18, %s915_s18 }
  0x34   :  { %849 = vmatmul.mubr.bf16.gmra.mrb[8].mxu1 %v903_v36 }
  0x35   :  { %852 = vmatprep.mubr.bf16.mxu1 %v910_v37  ;;  %p922_p3 = por %p921_p2, %p920_p1 }
  0x37   :  { %p923_p4 = pnand %p922_p3, %p916_p0 }
  0x3a   :  { %431 = vmatmul.mubr.bf16.gmra.mrb[12].mxu0 %v898_v38 }
  0x3b   :  { %438 = vmatprep.mubr.bf16.mxu0 %v899_v39 }
  0x3c   :  { %853 = vmatmul.mubr.bf16.gmra.mrb[12].mxu1 %v911_v40 }
  0x42   :  { %439 = vmatmul.mubr.bf16.gmra.mrb[16].mxu0 %v901_v41 }
  0x43   :  { %446 = vmatprep.mubr.bf16.mxu0 %v904_v42 }
  0x4a   :  { %447 = vmatmul.mubr.bf16.gmra.mrb[20].mxu0 %v906_v43  ;;  %v618_v43 = vld [vmem:[%s1240_s4 + $0x20] sm:$0xff] }
  0x4b   :  { %454 = vmatprep.mubr.bf16.mxu0 %v907_v44 }
  0x52   :  { %455 = vmatmul.mubr.bf16.gmra.mrb[24].mxu0 %v909_v45 }
  0x53   :  { %462 = vmatprep.mubr.bf16.mxu0 %v912_v46 }
  0x5a   :  { %463 = vmatmul.mubr.bf16.gmra.mrb[28].mxu0 %v914_v47  ;;  %v619_v47 = vld [vmem:[%s1240_s4 + $0x28] sm:$0xff] }
  0xf5   :  { %v760_v48 = vpop.f32.mrb[0].mxu0 }
  0xf6   :  { %v761_v49 = vpop.f32.mrb[1].mxu0 }
  0xf7   :  { %v762_v50 = vadd.f32 %v761_v49, %v760_v48  ;;  %v763_v51 = vpop.f32.mrb[2].mxu0  ;;  %v842_v52 = vpop.f32.mrb[0].mxu1 }
  0xf8   :  { %v764_v53 = vpop.f32.mrb[3].mxu0  ;;  %v505_v54 = vpop.f32.mrb[1].mxu1 }
  0xf9   :  { %v765_v56 = vadd.f32 %v764_v53, %v763_v51  ;;  %v506_v57 = vadd.f32 %v762_v50, %v505_v54  ;;  %v843_v58 = vpop.f32.mrb[2].mxu1 }
  0xfa   :  { %v508_v60 = vpop.f32.mrb[3].mxu1 }
  0xfb   :  { %v575_v61 = vmul.f32 %v1119_v55, %v506_v57  ;;  %v509_v62 = vadd.f32 %v765_v56, %v508_v60 }
  0xfd   :  { %v598_v0 = vadd.f32 %v1124_v59, %v575_v61  ;;  %v576_v1 = vmul.f32 %v1119_v55, %v509_v62  ;;  %v766_v2 = vpop.f32.mrb[4].mxu0 }
  0xfe   :  { %v767_v4 = vpop.f32.mrb[5].mxu0 }
  0xff   :  { %v630_v5 = vadd.f32 %v614_v63, %v598_v0  ;;  %v599_v6 = vadd.f32 %v1124_v59, %v576_v1  ;;  %v768_v7 = vadd.f32 %v767_v4, %v766_v2  ;;  %v769_v8 = vpop.f32.mrb[6].mxu0  ;;  %v846_v9 = vpop.f32.mrb[4].mxu1 }
 0x100   :  { %v770_v10 = vpop.f32.mrb[7].mxu0  ;;  %v521_v11 = vpop.f32.mrb[5].mxu1 }
 0x101   :  { %v646_v12 = vmax.f32 %v630_v5, 0.0  ;;  %v631_v13 = vadd.f32 %v615_v3, %v599_v6  ;;  %v514_v14 = vadd.f32 %v842_v52, %v768_v7  ;;  %v771_v15 = vadd.f32 %v770_v10, %v769_v8  ;;  %v847_v16 = vpop.f32.mrb[6].mxu1  ;;  %v620_v3 = vld [vmem:[%s1240_s4 + $0x30] sm:$0xff]  ;;  %v621_v7 = vld [vmem:[%s1240_s4 + $0x38] sm:$0xff] }
 0x102   :  { %v524_v17 = vpop.f32.mrb[7].mxu1 }
 0x103   :  { %662 = vst [vmem:[#allocation2] sm:$0xff] %v646_v12  ;;  %v647_v18 = vmax.f32 %v631_v13, 0.0  ;;  %v577_v19 = vmul.f32 %v1119_v55, %v514_v14  ;;  %v517_v20 = vadd.f32 %v843_v58, %v771_v15 }
 0x105   :  { %663 = vst [vmem:[#allocation2 + $0x8] sm:$0xff] %v647_v18  ;;  %v600_v22 = vadd.f32 %v1124_v59, %v577_v19  ;;  %v578_v23 = vmul.f32 %v1119_v55, %v517_v20  ;;  %v772_v24 = vpop.f32.mrb[8].mxu0 }
 0x106   :  { %v773_v26 = vpop.f32.mrb[9].mxu0 }
 0x107   :  { %v632_v27 = vadd.f32 %v616_v21, %v600_v22  ;;  %v601_v28 = vadd.f32 %v1124_v59, %v578_v23  ;;  %v774_v29 = vadd.f32 %v773_v26, %v772_v24  ;;  %v775_v30 = vpop.f32.mrb[10].mxu0  ;;  %v1146_v31 = vpop.f32.mrb[8].mxu1  ;;  %v622_v21 = vld [vmem:[%s1240_s4 + $0x40] sm:$0xff] }
 0x108   :  { %v776_v32 = vpop.f32.mrb[11].mxu0  ;;  %v537_v33 = vpop.f32.mrb[9].mxu1 }
 0x109   :  { %v648_v34 = vmax.f32 %v632_v27, 0.0  ;;  %v633_v35 = vadd.f32 %v617_v25, %v601_v28  ;;  %v777_v36 = vadd.f32 %v776_v32, %v775_v30  ;;  %v522_v37 = vadd.f32 %v774_v29, %v521_v11  ;;  %v1148_v38 = vpop.f32.mrb[10].mxu1  ;;  %v623_v25 = vld [vmem:[%s1240_s4 + $0x48] sm:$0xff] }
 0x10a   :  { %v540_v39 = vpop.f32.mrb[11].mxu1 }
 0x10b   :  { %664 = vst [vmem:[#allocation2 + $0x10] sm:$0xff] %v648_v34  ;;  %v649_v40 = vmax.f32 %v633_v35, 0.0  ;;  %v579_v41 = vmul.f32 %v1119_v55, %v522_v37  ;;  %v525_v42 = vadd.f32 %v777_v36, %v524_v17 }
 0x10d   :  { %665 = vst [vmem:[#allocation2 + $0x18] sm:$0xff] %v649_v40  ;;  %v602_v44 = vadd.f32 %v1124_v59, %v579_v41  ;;  %v580_v45 = vmul.f32 %v1119_v55, %v525_v42  ;;  %v778_v46 = vpop.f32.mrb[12].mxu0  ;;  %v624_v41 = vld [vmem:[%s1240_s4 + $0x50] sm:$0xff] }
 0x10e   :  { %v779_v48 = vpop.f32.mrb[13].mxu0 }
 0x10f   :  { %v634_v49 = vadd.f32 %v618_v43, %v602_v44  ;;  %v603_v50 = vadd.f32 %v1124_v59, %v580_v45  ;;  %v780_v51 = vadd.f32 %v779_v48, %v778_v46  ;;  %v781_v52 = vpop.f32.mrb[14].mxu0  ;;  %v1160_v53 = vpop.f32.mrb[12].mxu1 }
 0x110   :  { %v782_v54 = vpop.f32.mrb[15].mxu0  ;;  %v1162_v56 = vpop.f32.mrb[13].mxu1 }
 0x111   :  { %v650_v57 = vmax.f32 %v634_v49, 0.0  ;;  %v635_v58 = vadd.f32 %v619_v47, %v603_v50  ;;  %v530_v60 = vadd.f32 %v846_v9, %v780_v51  ;;  %v783_v61 = vadd.f32 %v782_v54, %v781_v52  ;;  %v1164_v62 = vpop.f32.mrb[14].mxu1 }
 0x112   :  { %v1166_v63 = vpop.f32.mrb[15].mxu1 }
 0x113   :  { %666 = vst [vmem:[#allocation2 + $0x20] sm:$0xff] %v650_v57  ;;  %v651_v0 = vmax.f32 %v635_v58, 0.0  ;;  %v581_v1 = vmul.f32 %v1119_v55, %v530_v60  ;;  %v533_v2 = vadd.f32 %v847_v16, %v783_v61  ;;  %v626_v61 = vld [vmem:[%s1240_s4 + $0x60] sm:$0xff] }
 0x115   :  { %667 = vst [vmem:[#allocation2 + $0x28] sm:$0xff] %v651_v0  ;;  %v604_v4 = vadd.f32 %v1124_v59, %v581_v1  ;;  %v582_v5 = vmul.f32 %v1119_v55, %v533_v2  ;;  %v784_v6 = vpop.f32.mrb[16].mxu0 }
 0x116   :  { %v785_v8 = vpop.f32.mrb[17].mxu0 }
 0x117   :  { %v636_v9 = vadd.f32 %v620_v3, %v604_v4  ;;  %v605_v10 = vadd.f32 %v1124_v59, %v582_v5  ;;  %v786_v11 = vadd.f32 %v785_v8, %v784_v6  ;;  %v787_v12 = vpop.f32.mrb[18].mxu0 }
 0x118   :  { %v788_v13 = vpop.f32.mrb[19].mxu0 }
 0x119   :  { %v652_v14 = vmax.f32 %v636_v9, 0.0  ;;  %v637_v15 = vadd.f32 %v621_v7, %v605_v10  ;;  %v789_v16 = vadd.f32 %v788_v13, %v787_v12  ;;  %v538_v17 = vadd.f32 %v786_v11, %v537_v33 }
 0x11b   :  { %668 = vst [vmem:[#allocation2 + $0x30] sm:$0xff] %v652_v14  ;;  %v653_v18 = vmax.f32 %v637_v15, 0.0  ;;  %v583_v19 = vmul.f32 %v1119_v55, %v538_v17  ;;  %v541_v20 = vadd.f32 %v789_v16, %v540_v39  ;;  %v628_v15 = vld [vmem:[%s1240_s4 + $0x70] sm:$0xff] }
 0x11d   :  { %669 = vst [vmem:[#allocation2 + $0x38] sm:$0xff] %v653_v18  ;;  %v606_v22 = vadd.f32 %v1124_v59, %v583_v19  ;;  %v584_v23 = vmul.f32 %v1119_v55, %v541_v20  ;;  %v790_v24 = vpop.f32.mrb[20].mxu0 }
 0x11e   :  { %v791_v26 = vpop.f32.mrb[21].mxu0 }
 0x11f   :  { %v638_v27 = vadd.f32 %v622_v21, %v606_v22  ;;  %v607_v28 = vadd.f32 %v1124_v59, %v584_v23  ;;  %v792_v29 = vadd.f32 %v791_v26, %v790_v24  ;;  %v793_v30 = vpop.f32.mrb[22].mxu0 }
 0x120   :  { %v794_v32 = vpop.f32.mrb[23].mxu0 }
 0x121   :  { %v654_v33 = vmax.f32 %v638_v27, 0.0  ;;  %v639_v34 = vadd.f32 %v623_v25, %v607_v28  ;;  %v546_v35 = vadd.f32 %v1146_v31, %v792_v29  ;;  %v795_v36 = vadd.f32 %v794_v32, %v793_v30  ;;  %v625_v31 = vld [vmem:[%s1240_s4 + $0x58] sm:$0xff] }
 0x123   :  { %670 = vst [vmem:[#allocation2 + $0x40] sm:$0xff] %v654_v33  ;;  %v655_v37 = vmax.f32 %v639_v34, 0.0  ;;  %v585_v39 = vmul.f32 %v1119_v55, %v546_v35  ;;  %v549_v40 = vadd.f32 %v1148_v38, %v795_v36 }
 0x125   :  { %671 = vst [vmem:[#allocation2 + $0x48] sm:$0xff] %v655_v37  ;;  %v608_v42 = vadd.f32 %v1124_v59, %v585_v39  ;;  %v586_v43 = vmul.f32 %v1119_v55, %v549_v40  ;;  %v796_v44 = vpop.f32.mrb[24].mxu0 }
 0x126   :  { %v797_v45 = vpop.f32.mrb[25].mxu0 }
 0x127   :  { %v640_v46 = vadd.f32 %v624_v41, %v608_v42  ;;  %v609_v47 = vadd.f32 %v1124_v59, %v586_v43  ;;  %v798_v48 = vadd.f32 %v797_v45, %v796_v44  ;;  %v799_v38 = vpop.f32.mrb[26].mxu0 }
 0x128   :  { %v800_v49 = vpop.f32.mrb[27].mxu0 }
 0x129   :  { %v656_v50 = vmax.f32 %v640_v46, 0.0  ;;  %v641_v51 = vadd.f32 %v625_v31, %v609_v47  ;;  %v801_v52 = vadd.f32 %v800_v49, %v799_v38  ;;  %v554_v54 = vadd.f32 %v798_v48, %v1162_v56  ;;  %v627_v56 = vld [vmem:[%s1240_s4 + $0x68] sm:$0xff] }
 0x12b   :  { %672 = vst [vmem:[#allocation2 + $0x50] sm:$0xff] %v656_v50  ;;  %v657_v57 = vmax.f32 %v641_v51, 0.0  ;;  %v587_v58 = vmul.f32 %v1119_v55, %v554_v54  ;;  %v557_v60 = vadd.f32 %v801_v52, %v1166_v63 }
 0x12d   :  { %673 = vst [vmem:[#allocation2 + $0x58] sm:$0xff] %v657_v57  ;;  %v610_v0 = vadd.f32 %v1124_v59, %v587_v58  ;;  %v588_v1 = vmul.f32 %v1119_v55, %v557_v60  ;;  %v802_v2 = vpop.f32.mrb[28].mxu0 }
 0x12e   :  { %v803_v3 = vpop.f32.mrb[29].mxu0 }
 0x12f   :  { %v642_v4 = vadd.f32 %v626_v61, %v610_v0  ;;  %v611_v5 = vadd.f32 %v1124_v59, %v588_v1  ;;  %v804_v6 = vadd.f32 %v803_v3, %v802_v2  ;;  %v805_v63 = vpop.f32.mrb[30].mxu0 }
 0x130   :  { %v806_v7 = vpop.f32.mrb[31].mxu0 }
 0x131   :  { %v658_v8 = vmax.f32 %v642_v4, 0.0  ;;  %v643_v9 = vadd.f32 %v627_v56, %v611_v5  ;;  %v562_v10 = vadd.f32 %v1160_v53, %v804_v6  ;;  %v807_v11 = vadd.f32 %v806_v7, %v805_v63  ;;  %v629_v53 = vld [vmem:[%s1240_s4 + $0x78] sm:$0xff] }
 0x133   :  { %674 = vst [vmem:[#allocation2 + $0x60] sm:$0xff] %v658_v8  ;;  %v659_v12 = vmax.f32 %v643_v9, 0.0  ;;  %v589_v13 = vmul.f32 %v1119_v55, %v562_v10  ;;  %v565_v14 = vadd.f32 %v1164_v62, %v807_v11 }
 0x135   :  { %675 = vst [vmem:[#allocation2 + $0x68] sm:$0xff] %v659_v12  ;;  %v612_v16 = vadd.f32 %v1124_v59, %v589_v13  ;;  %v590_v17 = vmul.f32 %v1119_v55, %v565_v14 }
 0x137   :  { %v644_v18 = vadd.f32 %v628_v15, %v612_v16  ;;  %v613_v19 = vadd.f32 %v1124_v59, %v590_v17 }
 0x139   :  { %v660_v20 = vmax.f32 %v644_v18, 0.0  ;;  %v645_v62 = vadd.f32 %v629_v53, %v613_v19 }
 0x13b   :  { %676 = vst [vmem:[#allocation2 + $0x70] sm:$0xff] %v660_v20  ;;  %v661_v21 = vmax.f32 %v645_v62, 0.0 }
 0x13d   :  { %677 = vst [vmem:[#allocation2 + $0x78] sm:$0xff] %v661_v21 }
 0x13e   :  { %926 = shalt.err (!%p923_p4)
}
 0x13f   :  { %s927_s20 = scalar_lea.hbm %s1241_s5, 2048 }
 0x140   :  { %p928_p5 = scmp.ne.s32.totalorder %s1241_s5, %s927_s20  ;;  %p931_p6 = scmp.lt.u32.totalorder %s927_s20, %s1241_s5 }
 0x142   :  { %p933_p7 = pnand %p931_p6, %p928_p5 }
 0x144   :  { %936 = shalt.err (!%p933_p7)
}
 0x145   :  { %s940_s25 = smov 128   ;;  %s941_s1 = smov 8  }
 0x146   :  { %689 = dma.vmem_to_hbm [thread:$0]  %s684_s3, 2048, %s1241_s5, [#allocation3], %s940_s25, %s940_s25, %s941_s1  }
 0x147   :  { %937 = dma.done.wait [#allocation3], 2048  }
 0x148   :  { %938 = vsyncadd [#allocation3], 4294965248 }
 0x149   :  { %693 = vsyncpa [#allocation3], 1 }

</bundles_post_ra>
